<compile_context>
chip_gen: v7x
topology: tpu7x:2x2x1
jax: 0.10.0
libtpu: 0.0.40
codegen_flags: <defaults>
</compile_context>

<pallas_src>
import math

import jax
import jax.numpy as jnp
from jax.experimental import pallas as pl
from jax.experimental.pallas import tpu as pltpu

_INV_SQRT2 = 1.0 / math.sqrt(2.0)


def _round_up(x, m):
    return ((x + m - 1) // m) * m


def _cdiv(a, b):
    return -(-a // b)


def _vmem_capacity_bytes():
    try:
        return int(pltpu.get_tpu_info().vmem_capacity_bytes)
    except Exception:
        return 64 << 20  # conservative (v7x per-TensorCore VMEM)


# ---------------------------------------------------------------------------
# Exact GELU (erf form, like torch.nn.GELU() default), sign handling folded:
#   gelu(x) = 0.5*x + 0.5*|x| * erf(|x|/sqrt(2))
# erf on [0, inf) via Abramowitz & Stegun 7.1.26; divide -> EUP reciprocal.
# ---------------------------------------------------------------------------
def _gelu_exact(x):
    a1, a2, a3, a4, a5 = 0.254829592, -0.284496736, 1.421413741, -1.453152027, 1.061405429
    p = 0.3275911
    absx = jnp.abs(x)
    ax = absx * _INV_SQRT2
    t = pl.reciprocal(1.0 + p * ax, approx=True)
    poly = ((((a5 * t + a4) * t + a3) * t + a2) * t + a1) * t
    erf_pos = 1.0 - poly * jnp.exp(-(ax * ax))
    return 0.5 * x + 0.5 * absx * erf_pos


# ---------------------------------------------------------------------------
# Kernel: one (TM, Dp) row tile of x, one (TH) slice of the hidden axis.
#   acc += GELU(x @ WfcT[:, h*TH:(h+1)*TH] + bfc[h]) @ WprT[h*TH:(h+1)*TH, :]
# Output written (+ bpr) on the last hidden step.
# ---------------------------------------------------------------------------
def _mlp_kernel(x_ref, wfc_ref, bfc_ref, wpr_ref, bpr_ref, o_ref, acc_ref):
    h_idx = pl.program_id(1)

    @pl.when(h_idx == 0)
    def _():
        acc_ref[...] = jnp.zeros_like(acc_ref)

    x = x_ref[...]
    h = jnp.dot(x, wfc_ref[...], preferred_element_type=jnp.float32) + bfc_ref[...]
    h = _gelu_exact(h)
    acc_ref[...] += jnp.dot(
        h.astype(wpr_ref.dtype), wpr_ref[...], preferred_element_type=jnp.float32
    )

    @pl.when(h_idx == pl.num_programs(1) - 1)
    def _():
        o_ref[...] = (acc_ref[...] + bpr_ref[...]).astype(o_ref.dtype)


# ---------------------------------------------------------------------------
# One-time parameter preparation (keep the transpose/pad OUT of the hot path).
#   wfc: (H, D), bfc: (H,), wpr: (D, H), bpr: (D,)   -- nn.Linear layouts.
# ---------------------------------------------------------------------------
def prepare_mlp_params(wfc, bfc, wpr, bpr, *, compute_dtype=jnp.bfloat16):
    hidden, d_model = wfc.shape
    assert wpr.shape == (d_model, hidden)
    Dp = _round_up(d_model, 128)   # lane-aligned feature dims
    Hp = _round_up(hidden, 128)
    cdt = jnp.dtype(compute_dtype)
    return dict(
        wfc=jnp.pad(wfc.T.astype(cdt), ((0, Dp - d_model), (0, Hp - hidden))),
        bfc=jnp.pad(bfc.astype(jnp.float32), (0, Hp - hidden))[None, :],
        wpr=jnp.pad(wpr.T.astype(cdt), ((0, Hp - hidden), (0, Dp - d_model))),
        bpr=jnp.pad(bpr.astype(jnp.float32), (0, Dp - d_model))[None, :],
        d_model=d_model, hidden=hidden, Dp=Dp, Hp=Hp, compute_dtype=cdt,
    )


# ---------------------------------------------------------------------------
# Forward: pads/tiles x, launches the grid, un-pads.  Returns compute dtype.
# ---------------------------------------------------------------------------
def mlp_forward(x, params, *, block_rows=512, single_buffer_weights=True):
    d_model = params["d_model"]
    Dp, Hp = params["Dp"], params["Hp"]
    cdt = params["compute_dtype"]
    itemsize = cdt.itemsize

    orig_shape = x.shape
    assert orig_shape[-1] == d_model
    R = int(math.prod(orig_shape[:-1]))

    # Balanced, sublane-aligned row tile (avoid padding up to TM-1 junk rows).
    n_row_tiles = max(1, _cdiv(R, max(8, block_rows)))
    TM = _round_up(_cdiv(R, n_row_tiles), 8)

    cap = _vmem_capacity_bytes()
    budget = int(cap * 0.75)   # leave headroom for compiler scratch/semaphores

    def vmem_need(tm, th, wbuf):
        return (2 * tm * Dp * itemsize               # x tile (double-buffered)
                + 2 * tm * Dp * itemsize             # out tile (double-buffered)
                + tm * Dp * 4                        # f32 accumulator scratch
                + wbuf * 2 * th * Dp * itemsize      # Wfc + Wpr tiles
                + wbuf * (th + Dp) * 4               # bias rows
                + 2 * tm * th * 4)                   # hidden-activation temps

    TH = Hp
    if vmem_need(TM, Hp, 1) > budget:
        # Shrink the row tile first if even the smallest hidden tile won't fit.
        while TM > 8 and vmem_need(TM, 128, 2) > budget:
            TM = _round_up(TM // 2, 8)
        # Largest hidden tile that divides Hp and fits (weights stream, 2-buf).
        m = Hp // 128
        TH = 128
        for k in range(m, 0, -1):
            if m % k == 0 and vmem_need(TM, 128 * k, 2) <= budget:
                TH = 128 * k
                break

    Rp = _round_up(R, TM)
    n_h = Hp // TH
    grid = (Rp // TM, n_h)

    x2 = jnp.pad(x.reshape(R, d_model).astype(cdt), ((0, Rp - R), (0, Dp - d_model)))

    vmem_limit = int(min(max(vmem_need(TM, TH, 2) + (4 << 20), 32 << 20), budget))

    def run(use_single_buffer):
        def const_spec(shape):
            if use_single_buffer:
                return pl.BlockSpec(shape, lambda i, h: (0, 0),
                                    pipeline_mode=pl.Buffered(1))
            return pl.BlockSpec(shape, lambda i, h: (0, 0))

        if n_h == 1:   # weights fully resident -> constant index maps
            wfc_spec = const_spec((Dp, TH))
            bfc_spec = const_spec((1, TH))
            wpr_spec = const_spec((TH, Dp))
        else:          # weights stream over the hidden axis
            wfc_spec = pl.BlockSpec((Dp, TH), lambda i, h: (0, h))
            bfc_spec = pl.BlockSpec((1, TH), lambda i, h: (0, h))
            wpr_spec = pl.BlockSpec((TH, Dp), lambda i, h: (h, 0))
        bpr_spec = const_spec((1, Dp))

        return pl.pallas_call(
            _mlp_kernel,
            out_shape=jax.ShapeDtypeStruct((Rp, Dp), cdt),
            grid=grid,
            in_specs=[
                pl.BlockSpec((TM, Dp), lambda i, h: (i, 0)),   # x rows stream
                wfc_spec, bfc_spec, wpr_spec, bpr_spec,
            ],
            out_specs=pl.BlockSpec((TM, Dp), lambda i, h: (i, 0)),
            scratch_shapes=[pltpu.VMEM((TM, Dp), jnp.float32)],
            compiler_params=pltpu.CompilerParams(
                dimension_semantics=("parallel", "arbitrary"),
                vmem_limit_bytes=vmem_limit,
            ),
        )(x2, params["wfc"], params["bfc"], params["wpr"], params["bpr"])

    try:
        out = run(single_buffer_weights and n_h == 1)
    except Exception:
        # Fallback: default double-buffering (older jax without pipeline_mode, etc.)
        out = run(False)

    return out[:R, :d_model].reshape(orig_shape)


# ---------------------------------------------------------------------------
# Demo / self-check (small shapes consistent with DWNConfig: dim_amp=4).
# ---------------------------------------------------------------------------
if __name__ == "__main__":
    jax.config.update("jax_default_matmul_precision", "highest")

    batch, seq, d_model, dim_amp = 2, 8, 32, 4
    hidden = dim_amp * d_model

    key = jax.random.PRNGKey(0)
    k_x, k_fw, k_fb, k_pw, k_pb = jax.random.split(key, 5)

    def linear_init(kw, kb, out_f, in_f):
        bound = 1.0 / math.sqrt(in_f)
        w = jax.random.uniform(kw, (out_f, in_f), jnp.float32, -bound, bound)
        b = jax.random.uniform(kb, (out_f,), jnp.float32, -bound, bound)
        return w, b

    wfc, bfc = linear_init(k_fw, k_fb, hidden, d_model)     # c_fc  : Linear(d, 4d)
    wpr, bpr = linear_init(k_pw, k_pb, d_model, hidden)     # c_proj: Linear(4d, d)
    x = jax.random.normal(k_x, (batch, seq, d_model), jnp.float32)

    # Pure-JAX f32 reference of the torch forward (dropout=0 -> Identity).
    h_ref = jax.nn.gelu(x @ wfc.T + bfc, approximate=False)
    y_ref = h_ref @ wpr.T + bpr
    ref_scale = float(jnp.max(jnp.abs(y_ref))) + 1e-8

    # f32 path (matches torch numerics closely).
    params_f32 = prepare_mlp_params(wfc, bfc, wpr, bpr, compute_dtype=jnp.float32)
    y_f32 = jax.block_until_ready(mlp_forward(x, params_f32))
    assert y_f32.shape == x.shape, y_f32.shape
    rel_f32 = float(jnp.max(jnp.abs(y_f32.astype(jnp.float32) - y_ref))) / ref_scale
    assert rel_f32 < 5e-3, f"f32 kernel/reference mismatch, rel={rel_f32}"

    # bf16 path (default; halves DMA/VMEM and uses native MXU bf16).
    params_bf16 = prepare_mlp_params(wfc, bfc, wpr, bpr, compute_dtype=jnp.bfloat16)
    y_bf16 = jax.block_until_ready(mlp_forward(x, params_bf16))
    assert y_bf16.shape == x.shape, y_bf16.shape
    rel_bf16 = float(jnp.max(jnp.abs(y_bf16.astype(jnp.float32) - y_ref))) / ref_scale
    assert rel_bf16 < 5e-2, f"bf16 kernel/reference mismatch, rel={rel_bf16}"

    print("KERNEL_OK")
</pallas_src>

<mosaic_0001>
module attributes {stable_mosaic.version = 11 : i64} {
  func.func @_mlp_kernel(%arg0: i32, %arg1: i32, %arg2: memref<16x128xf32, #tpu.memory_space<vmem>>, %arg3: memref<128x128xf32, #tpu.memory_space<vmem>>, %arg4: memref<1x128xf32, #tpu.memory_space<vmem>>, %arg5: memref<128x128xf32, #tpu.memory_space<vmem>>, %arg6: memref<1x128xf32, #tpu.memory_space<vmem>>, %arg7: memref<16x128xf32, #tpu.memory_space<vmem>>, %arg8: memref<16x128xf32, #tpu.memory_space<vmem>>) attributes {dimension_semantics = [#tpu.dimension_semantics<parallel>, #tpu.dimension_semantics<arbitrary>], iteration_bounds = array<i64: 1, 1>, scalar_prefetch = 0 : i64, scratch_operands = 1 : i64, tpu.core_type = #tpu.core_type<tc>, window_params = [{transform_indices = @transform_0, window_bounds = array<i64: 16, 128>}, {pipeline_mode = #tpu.pipeline_mode<synchronous>, transform_indices = @transform_1, window_bounds = array<i64: 128, 128>}, {pipeline_mode = #tpu.pipeline_mode<synchronous>, transform_indices = @transform_2, window_bounds = array<i64: 1, 128>}, {pipeline_mode = #tpu.pipeline_mode<synchronous>, transform_indices = @transform_3, window_bounds = array<i64: 128, 128>}, {pipeline_mode = #tpu.pipeline_mode<synchronous>, transform_indices = @transform_4, window_bounds = array<i64: 1, 128>}, {transform_indices = @transform_5, window_bounds = array<i64: 16, 128>}]} {
    %c0_i32 = arith.constant 0 : i32
    %0 = arith.cmpi eq, %arg1, %c0_i32 : i32
    %1 = arith.extui %0 : i1 to i32
    %c0_i32_0 = arith.constant 0 : i32
    %2 = arith.cmpi ne, %1, %c0_i32_0 : i32
    scf.if %2 {
      %cst_27 = arith.constant 0.000000e+00 : f32
      %52 = vector.broadcast %cst_27 : f32 to vector<16x128xf32>
      %c0_28 = arith.constant 0 : index
      %c0_29 = arith.constant 0 : index
      %53 = vector.load %arg8[%c0_28, %c0_29] : memref<16x128xf32, #tpu.memory_space<vmem>>, vector<16x128xf32>
      tpu.vector_store %arg8[%c0_28, %c0_29], %52 {strides = array<i32>} : memref<16x128xf32, #tpu.memory_space<vmem>>, vector<16x128xf32>,
    } else {
    }
    %c0 = arith.constant 0 : index
    %c0_1 = arith.constant 0 : index
    %3 = vector.load %arg2[%c0, %c0_1] : memref<16x128xf32, #tpu.memory_space<vmem>>, vector<16x128xf32>
    %c0_2 = arith.constant 0 : index
    %c0_3 = arith.constant 0 : index
    %4 = vector.load %arg3[%c0_2, %c0_3] : memref<128x128xf32, #tpu.memory_space<vmem>>, vector<128x128xf32>
    %cst = arith.constant dense<0.000000e+00> : vector<16x128xf32>
    %5 = tpu.matmul %3, %4, %cst {dimension_numbers = #tpu.dot_dimension_numbers<[1], [0], [0], [1], [0, 0, 1, 1], [], []>, precision = #tpu.contract_precision<fp32>} : vector<16x128xf32>, vector<128x128xf32>, vector<16x128xf32> -> vector<16x128xf32>
    %c0_4 = arith.constant 0 : index
    %c0_5 = arith.constant 0 : index
    %6 = vector.load %arg4[%c0_4, %c0_5] : memref<1x128xf32, #tpu.memory_space<vmem>>, vector<1x128xf32>
    %7 = vector.broadcast %6 : vector<1x128xf32> to vector<16x128xf32>
    %8 = arith.addf %5, %7 : vector<16x128xf32>
    %9 = math.absf %8 : vector<16x128xf32>
    %cst_6 = arith.constant 0.707106769 : f32
    %10 = vector.broadcast %cst_6 : f32 to vector<16x128xf32>
    %11 = arith.mulf %9, %10 : vector<16x128xf32>
    %cst_7 = arith.constant 0.327591091 : f32
    %12 = vector.broadcast %cst_7 : f32 to vector<16x128xf32>
    %13 = arith.mulf %12, %11 : vector<16x128xf32>
    %cst_8 = arith.constant 1.000000e+00 : f32
    %14 = vector.broadcast %cst_8 : f32 to vector<16x128xf32>
    %15 = arith.addf %14, %13 : vector<16x128xf32>
    %16 = tpu.reciprocal %15 {approx = true} : vector<16x128xf32> -> vector<16x128xf32>
    %cst_9 = arith.constant 1.06140542 : f32
    %17 = vector.broadcast %cst_9 : f32 to vector<16x128xf32>
    %18 = arith.mulf %17, %16 : vector<16x128xf32>
    %cst_10 = arith.constant -1.45315206 : f32
    %19 = vector.broadcast %cst_10 : f32 to vector<16x128xf32>
    %20 = arith.addf %18, %19 : vector<16x128xf32>
    %21 = arith.mulf %20, %16 : vector<16x128xf32>
    %cst_11 = arith.constant 1.42141378 : f32
    %22 = vector.broadcast %cst_11 : f32 to vector<16x128xf32>
    %23 = arith.addf %21, %22 : vector<16x128xf32>
    %24 = arith.mulf %23, %16 : vector<16x128xf32>
    %cst_12 = arith.constant -0.284496725 : f32
    %25 = vector.broadcast %cst_12 : f32 to vector<16x128xf32>
    %26 = arith.addf %24, %25 : vector<16x128xf32>
    %27 = arith.mulf %26, %16 : vector<16x128xf32>
    %cst_13 = arith.constant 0.254829586 : f32
    %28 = vector.broadcast %cst_13 : f32 to vector<16x128xf32>
    %29 = arith.addf %27, %28 : vector<16x128xf32>
    %30 = arith.mulf %29, %16 : vector<16x128xf32>
    %31 = arith.mulf %11, %11 : vector<16x128xf32>
    %cst_14 = arith.constant 0.000000e+00 : f32
    %32 = vector.broadcast %cst_14 : f32 to vector<16x128xf32>
    %33 = arith.subf %32, %31 : vector<16x128xf32>
    %34 = math.exp %33 : vector<16x128xf32>
    %35 = arith.mulf %30, %34 : vector<16x128xf32>
    %cst_15 = arith.constant 1.000000e+00 : f32
    %36 = vector.broadcast %cst_15 : f32 to vector<16x128xf32>
    %37 = arith.subf %36, %35 : vector<16x128xf32>
    %cst_16 = arith.constant 5.000000e-01 : f32
    %38 = vector.broadcast %cst_16 : f32 to vector<16x128xf32>
    %39 = arith.mulf %38, %8 : vector<16x128xf32>
    %cst_17 = arith.constant 5.000000e-01 : f32
    %40 = vector.broadcast %cst_17 : f32 to vector<16x128xf32>
    %41 = arith.mulf %40, %9 : vector<16x128xf32>
    %42 = arith.mulf %41, %37 : vector<16x128xf32>
    %43 = arith.addf %39, %42 : vector<16x128xf32>
    %c0_18 = arith.constant 0 : index
    %c0_19 = arith.constant 0 : index
    %44 = vector.load %arg8[%c0_18, %c0_19] : memref<16x128xf32, #tpu.memory_space<vmem>>, vector<16x128xf32>
    %c0_20 = arith.constant 0 : index
    %c0_21 = arith.constant 0 : index
    %45 = vector.load %arg5[%c0_20, %c0_21] : memref<128x128xf32, #tpu.memory_space<vmem>>, vector<128x128xf32>
    %cst_22 = arith.constant dense<0.000000e+00> : vector<16x128xf32>
    %46 = tpu.matmul %43, %45, %cst_22 {dimension_numbers = #tpu.dot_dimension_numbers<[1], [0], [0], [1], [0, 0, 1, 1], [], []>, precision = #tpu.contract_precision<fp32>} : vector<16x128xf32>, vector<128x128xf32>, vector<16x128xf32> -> vector<16x128xf32>
    %47 = arith.addf %44, %46 : vector<16x128xf32>
    %c0_23 = arith.constant 0 : index
    %c0_24 = arith.constant 0 : index
    %48 = vector.load %arg8[%c0_23, %c0_24] : memref<16x128xf32, #tpu.memory_space<vmem>>, vector<16x128xf32>
    tpu.vector_store %arg8[%c0_23, %c0_24], %47 {strides = array<i32>} : memref<16x128xf32, #tpu.memory_space<vmem>>, vector<16x128xf32>,
    %c0_i32_25 = arith.constant 0 : i32
    %49 = arith.cmpi eq, %arg1, %c0_i32_25 : i32
    %50 = arith.extui %49 : i1 to i32
    %c0_i32_26 = arith.constant 0 : i32
    %51 = arith.cmpi ne, %50, %c0_i32_26 : i32
    scf.if %51 {
      %c0_27 = arith.constant 0 : index
      %c0_28 = arith.constant 0 : index
      %52 = vector.load %arg8[%c0_27, %c0_28] : memref<16x128xf32, #tpu.memory_space<vmem>>, vector<16x128xf32>
      %c0_29 = arith.constant 0 : index
      %c0_30 = arith.constant 0 : index
      %53 = vector.load %arg6[%c0_29, %c0_30] : memref<1x128xf32, #tpu.memory_space<vmem>>, vector<1x128xf32>
      %54 = vector.broadcast %53 : vector<1x128xf32> to vector<16x128xf32>
      %55 = arith.addf %52, %54 : vector<16x128xf32>
      %c0_31 = arith.constant 0 : index
      %c0_32 = arith.constant 0 : index
      %56 = vector.load %arg7[%c0_31, %c0_32] : memref<16x128xf32, #tpu.memory_space<vmem>>, vector<16x128xf32>
      tpu.vector_store %arg7[%c0_31, %c0_32], %55 {strides = array<i32>} : memref<16x128xf32, #tpu.memory_space<vmem>>, vector<16x128xf32>,
    } else {
    }
    return
  }
  func.func @transform_0(%arg0: i32, %arg1: i32) -> (i32, i32) {
    %c0_i32 = arith.constant 0 : i32
    %c0_i32_0 = arith.constant 0 : i32
    return %arg0, %c0_i32 : i32, i32
  }
  func.func @transform_1(%arg0: i32, %arg1: i32) -> (i32, i32) {
    %c0_i32 = arith.constant 0 : i32
    %c0_i32_0 = arith.constant 0 : i32
    %c0_i32_1 = arith.constant 0 : i32
    return %c0_i32, %c0_i32_0 : i32, i32
  }
  func.func @transform_2(%arg0: i32, %arg1: i32) -> (i32, i32) {
    %c0_i32 = arith.constant 0 : i32
    %c0_i32_0 = arith.constant 0 : i32
    %c0_i32_1 = arith.constant 0 : i32
    return %c0_i32, %c0_i32_0 : i32, i32
  }
  func.func @transform_3(%arg0: i32, %arg1: i32) -> (i32, i32) {
    %c0_i32 = arith.constant 0 : i32
    %c0_i32_0 = arith.constant 0 : i32
    %c0_i32_1 = arith.constant 0 : i32
    return %c0_i32, %c0_i32_0 : i32, i32
  }
  func.func @transform_4(%arg0: i32, %arg1: i32) -> (i32, i32) {
    %c0_i32 = arith.constant 0 : i32
    %c0_i32_0 = arith.constant 0 : i32
    %c0_i32_1 = arith.constant 0 : i32
    return %c0_i32, %c0_i32_0 : i32, i32
  }
  func.func @transform_5(%arg0: i32, %arg1: i32) -> (i32, i32) {
    %c0_i32 = arith.constant 0 : i32
    %c0_i32_0 = arith.constant 0 : i32
    return %arg0, %c0_i32 : i32, i32
  }
}

module attributes {stable_mosaic.version = 11 : i64} {
  func.func @_mlp_kernel(%arg0: i32, %arg1: i32, %arg2: memref<16x128xf32, #tpu.memory_space<vmem>>, %arg3: memref<128x128xf32, #tpu.memory_space<vmem>>, %arg4: memref<1x128xf32, #tpu.memory_space<vmem>>, %arg5: memref<128x128xf32, #tpu.memory_space<vmem>>, %arg6: memref<1x128xf32, #tpu.memory_space<vmem>>, %arg7: memref<16x128xf32, #tpu.memory_space<vmem>>, %arg8: memref<16x128xf32, #tpu.memory_space<vmem>>) attributes {dimension_semantics = [#tpu.dimension_semantics<parallel>, #tpu.dimension_semantics<arbitrary>], iteration_bounds = array<i64: 1, 1>, scalar_prefetch = 0 : i64, scratch_operands = 1 : i64, tpu.core_type = #tpu.core_type<tc>, window_params = [{transform_indices = @transform_0, window_bounds = array<i64: 16, 128>}, {pipeline_mode = #tpu.pipeline_mode<synchronous>, transform_indices = @transform_1, window_bounds = array<i64: 128, 128>}, {pipeline_mode = #tpu.pipeline_mode<synchronous>, transform_indices = @transform_2, window_bounds = array<i64: 1, 128>}, {pipeline_mode = #tpu.pipeline_mode<synchronous>, transform_indices = @transform_3, window_bounds = array<i64: 128, 128>}, {pipeline_mode = #tpu.pipeline_mode<synchronous>, transform_indices = @transform_4, window_bounds = array<i64: 1, 128>}, {transform_indices = @transform_5, window_bounds = array<i64: 16, 128>}]} {
    %c0_i32 = arith.constant 0 : i32
    %0 = arith.cmpi eq, %arg1, %c0_i32 : i32
    %1 = arith.extui %0 : i1 to i32
    %c0_i32_0 = arith.constant 0 : i32
    %2 = arith.cmpi ne, %1, %c0_i32_0 : i32
    scf.if %2 {
      %cst_27 = arith.constant 0.000000e+00 : f32
      %52 = vector.broadcast %cst_27 : f32 to vector<16x128xf32>
      %c0_28 = arith.constant 0 : index
      %c0_29 = arith.constant 0 : index
      %53 = vector.load %arg8[%c0_28, %c0_29] : memref<16x128xf32, #tpu.memory_space<vmem>>, vector<16x128xf32>
      tpu.vector_store %arg8[%c0_28, %c0_29], %52 {strides = array<i32>} : memref<16x128xf32, #tpu.memory_space<vmem>>, vector<16x128xf32>,
    } else {
    }
    %c0 = arith.constant 0 : index
    %c0_1 = arith.constant 0 : index
    %3 = vector.load %arg2[%c0, %c0_1] : memref<16x128xf32, #tpu.memory_space<vmem>>, vector<16x128xf32>
    %c0_2 = arith.constant 0 : index
    %c0_3 = arith.constant 0 : index
    %4 = vector.load %arg3[%c0_2, %c0_3] : memref<128x128xf32, #tpu.memory_space<vmem>>, vector<128x128xf32>
    %cst = arith.constant dense<0.000000e+00> : vector<16x128xf32>
    %5 = tpu.matmul %3, %4, %cst {dimension_numbers = #tpu.dot_dimension_numbers<[1], [0], [0], [1], [0, 0, 1, 1], [], []>, precision = #tpu.contract_precision<fp32>} : vector<16x128xf32>, vector<128x128xf32>, vector<16x128xf32> -> vector<16x128xf32>
    %c0_4 = arith.constant 0 : index
    %c0_5 = arith.constant 0 : index
    %6 = vector.load %arg4[%c0_4, %c0_5] : memref<1x128xf32, #tpu.memory_space<vmem>>, vector<1x128xf32>
    %7 = vector.broadcast %6 : vector<1x128xf32> to vector<16x128xf32>
    %8 = arith.addf %5, %7 : vector<16x128xf32>
    %9 = math.absf %8 : vector<16x128xf32>
    %cst_6 = arith.constant 0.707106769 : f32
    %10 = vector.broadcast %cst_6 : f32 to vector<16x128xf32>
    %11 = arith.mulf %9, %10 : vector<16x128xf32>
    %cst_7 = arith.constant 0.327591091 : f32
    %12 = vector.broadcast %cst_7 : f32 to vector<16x128xf32>
    %13 = arith.mulf %12, %11 : vector<16x128xf32>
    %cst_8 = arith.constant 1.000000e+00 : f32
    %14 = vector.broadcast %cst_8 : f32 to vector<16x128xf32>
    %15 = arith.addf %14, %13 : vector<16x128xf32>
    %16 = tpu.reciprocal %15 {approx = true} : vector<16x128xf32> -> vector<16x128xf32>
    %cst_9 = arith.constant 1.06140542 : f32
    %17 = vector.broadcast %cst_9 : f32 to vector<16x128xf32>
    %18 = arith.mulf %17, %16 : vector<16x128xf32>
    %cst_10 = arith.constant -1.45315206 : f32
    %19 = vector.broadcast %cst_10 : f32 to vector<16x128xf32>
    %20 = arith.addf %18, %19 : vector<16x128xf32>
    %21 = arith.mulf %20, %16 : vector<16x128xf32>
    %cst_11 = arith.constant 1.42141378 : f32
    %22 = vector.broadcast %cst_11 : f32 to vector<16x128xf32>
    %23 = arith.addf %21, %22 : vector<16x128xf32>
    %24 = arith.mulf %23, %16 : vector<16x128xf32>
    %cst_12 = arith.constant -0.284496725 : f32
    %25 = vector.broadcast %cst_12 : f32 to vector<16x128xf32>
    %26 = arith.addf %24, %25 : vector<16x128xf32>
    %27 = arith.mulf %26, %16 : vector<16x128xf32>
    %cst_13 = arith.constant 0.254829586 : f32
    %28 = vector.broadcast %cst_13 : f32 to vector<16x128xf32>
    %29 = arith.addf %27, %28 : vector<16x128xf32>
    %30 = arith.mulf %29, %16 : vector<16x128xf32>
    %31 = arith.mulf %11, %11 : vector<16x128xf32>
    %cst_14 = arith.constant 0.000000e+00 : f32
    %32 = vector.broadcast %cst_14 : f32 to vector<16x128xf32>
    %33 = arith.subf %32, %31 : vector<16x128xf32>
    %34 = math.exp %33 : vector<16x128xf32>
    %35 = arith.mulf %30, %34 : vector<16x128xf32>
    %cst_15 = arith.constant 1.000000e+00 : f32
    %36 = vector.broadcast %cst_15 : f32 to vector<16x128xf32>
    %37 = arith.subf %36, %35 : vector<16x128xf32>
    %cst_16 = arith.constant 5.000000e-01 : f32
    %38 = vector.broadcast %cst_16 : f32 to vector<16x128xf32>
    %39 = arith.mulf %38, %8 : vector<16x128xf32>
    %cst_17 = arith.constant 5.000000e-01 : f32
    %40 = vector.broadcast %cst_17 : f32 to vector<16x128xf32>
    %41 = arith.mulf %40, %9 : vector<16x128xf32>
    %42 = arith.mulf %41, %37 : vector<16x128xf32>
    %43 = arith.addf %39, %42 : vector<16x128xf32>
    %c0_18 = arith.constant 0 : index
    %c0_19 = arith.constant 0 : index
    %44 = vector.load %arg8[%c0_18, %c0_19] : memref<16x128xf32, #tpu.memory_space<vmem>>, vector<16x128xf32>
    %c0_20 = arith.constant 0 : index
    %c0_21 = arith.constant 0 : index
    %45 = vector.load %arg5[%c0_20, %c0_21] : memref<128x128xf32, #tpu.memory_space<vmem>>, vector<128x128xf32>
    %cst_22 = arith.constant dense<0.000000e+00> : vector<16x128xf32>
    %46 = tpu.matmul %43, %45, %cst_22 {dimension_numbers = #tpu.dot_dimension_numbers<[1], [0], [0], [1], [0, 0, 1, 1], [], []>, precision = #tpu.contract_precision<fp32>} : vector<16x128xf32>, vector<128x128xf32>, vector<16x128xf32> -> vector<16x128xf32>
    %47 = arith.addf %44, %46 : vector<16x128xf32>
    %c0_23 = arith.constant 0 : index
    %c0_24 = arith.constant 0 : index
    %48 = vector.load %arg8[%c0_23, %c0_24] : memref<16x128xf32, #tpu.memory_space<vmem>>, vector<16x128xf32>
    tpu.vector_store %arg8[%c0_23, %c0_24], %47 {strides = array<i32>} : memref<16x128xf32, #tpu.memory_space<vmem>>, vector<16x128xf32>,
    %c0_i32_25 = arith.constant 0 : i32
    %49 = arith.cmpi eq, %arg1, %c0_i32_25 : i32
    %50 = arith.extui %49 : i1 to i32
    %c0_i32_26 = arith.constant 0 : i32
    %51 = arith.cmpi ne, %50, %c0_i32_26 : i32
    scf.if %51 {
      %c0_27 = arith.constant 0 : index
      %c0_28 = arith.constant 0 : index
      %52 = vector.load %arg8[%c0_27, %c0_28] : memref<16x128xf32, #tpu.memory_space<vmem>>, vector<16x128xf32>
      %c0_29 = arith.constant 0 : index
      %c0_30 = arith.constant 0 : index
      %53 = vector.load %arg6[%c0_29, %c0_30] : memref<1x128xf32, #tpu.memory_space<vmem>>, vector<1x128xf32>
      %54 = vector.broadcast %53 : vector<1x128xf32> to vector<16x128xf32>
      %55 = arith.addf %52, %54 : vector<16x128xf32>
      %c0_31 = arith.constant 0 : index
      %c0_32 = arith.constant 0 : index
      %56 = vector.load %arg7[%c0_31, %c0_32] : memref<16x128xf32, #tpu.memory_space<vmem>>, vector<16x128xf32>
      tpu.vector_store %arg7[%c0_31, %c0_32], %55 {strides = array<i32>} : memref<16x128xf32, #tpu.memory_space<vmem>>, vector<16x128xf32>,
    } else {
    }
    return
  }
  func.func @transform_0(%arg0: i32, %arg1: i32) -> (i32, i32) {
    %c0_i32 = arith.constant 0 : i32
    %c0_i32_0 = arith.constant 0 : i32
    return %arg0, %c0_i32 : i32, i32
  }
  func.func @transform_1(%arg0: i32, %arg1: i32) -> (i32, i32) {
    %c0_i32 = arith.constant 0 : i32
    %c0_i32_0 = arith.constant 0 : i32
    %c0_i32_1 = arith.constant 0 : i32
    return %c0_i32, %c0_i32_0 : i32, i32
  }
  func.func @transform_2(%arg0: i32, %arg1: i32) -> (i32, i32) {
    %c0_i32 = arith.constant 0 : i32
    %c0_i32_0 = arith.constant 0 : i32
    %c0_i32_1 = arith.constant 0 : i32
    return %c0_i32, %c0_i32_0 : i32, i32
  }
  func.func @transform_3(%arg0: i32, %arg1: i32) -> (i32, i32) {
    %c0_i32 = arith.constant 0 : i32
    %c0_i32_0 = arith.constant 0 : i32
    %c0_i32_1 = arith.constant 0 : i32
    return %c0_i32, %c0_i32_0 : i32, i32
  }
  func.func @transform_4(%arg0: i32, %arg1: i32) -> (i32, i32) {
    %c0_i32 = arith.constant 0 : i32
    %c0_i32_0 = arith.constant 0 : i32
    %c0_i32_1 = arith.constant 0 : i32
    return %c0_i32, %c0_i32_0 : i32, i32
  }
  func.func @transform_5(%arg0: i32, %arg1: i32) -> (i32, i32) {
    %c0_i32 = arith.constant 0 : i32
    %c0_i32_0 = arith.constant 0 : i32
    return %arg0, %c0_i32 : i32, i32
  }
}

</mosaic_0001>

<bundles_post_ra>
// kernel: tpu_custom_call.1
= control target key start
LH: loop header
LB: loop body
LE: loop exit
PB: predicated region body
PF: predicated region fallthrough
CT: control target
= control target key end

     0   :  { %10 = vsyncpa [#allocation4], 0  ;;  %s3381_s0 = inlined_call_operand.hbm [shape: f32[16,128], index: 0, kind: input, shape index: {}]   ;;  %s3382_s1 = inlined_call_operand.hbm [shape: f32[128,128], index: 1, kind: input, shape index: {}]   ;;  %s3383_s2 = inlined_call_operand.vmem [shape: f32[1,128], index: 2, kind: input, shape index: {}]   ;;  %s3384_s3 = inlined_call_operand.hbm [shape: f32[128,128], index: 3, kind: input, shape index: {}]   ;;  %s3385_s4 = inlined_call_operand.vmem [shape: f32[1,128], index: 4, kind: input, shape index: {}]   ;;  %s3386_s5 = inlined_call_operand.hbm [shape: f32[16,128], index: 5, kind: output, shape index: {}]  }
   0x1   :  { %11 = vsyncpa [#allocation7], 0 }
   0x2   :  { %12 = vsyncpa [#allocation5], 0  ;;  %s2717_s18 = smov [#allocation6]   ;;  %s2718_s20 = smov [#allocation3]  }
   0x3   :  { %s30_s19 = sshll.u32 %s2717_s18, 4  ;;  %s18_s21 = sshll.u32 %s2718_s20, 4  ;;  %s31_s19 = int_to_ptr.vmem [resolvable:$true] %s30_s19  ;;  %s2753_s21 = int_to_ptr.vmem [resolvable:$true] %s18_s21 }
   0x4   :  { %s2623_s24 = scalar_lea.hbm %s3382_s1, 2048 }
   0x5   :  { %p2624_p0 = scmp.ne.s32.totalorder %s3382_s1, %s2623_s24  ;;  %p2627_p1 = scmp.lt.u32.totalorder %s2623_s24, %s3382_s1 }
   0x7   :  { %p2629_p2 = pnand %p2627_p1, %p2624_p0 }
   0x9   :  { %2632 = shalt.err (!%p2629_p2)
}
   0xa   :  { %s2633_s29 = scalar_lea.vmem %s31_s19, 2048  ;;  %p2638_p4 = scmp.lt.s32.totalorder %s31_s19, %s31_s19 }
   0xb   :  { %p2634_p3 = scmp.ne.s32.totalorder %s31_s19, %s2633_s29  ;;  %p2639_p5 = scmp.lt.s32.totalorder %s2633_s29, %s2633_s29 }
   0xd   :  { %p2640_p6 = por %p2639_p5, %p2638_p4 }
   0xf   :  { %p2641_p7 = pnand %p2640_p6, %p2634_p3 }
  0x11   :  { %2644 = shalt.err (!%p2641_p7)
}
  0x12   :  { %s2719_s30 = smov 128   ;;  %s2720_s6 = smov 8  }
  0x13   :  { %36 = dma.hbm_to_vmem [thread:$0]  %s3382_s1, 2048, %s31_s19, [#allocation7], %s2719_s30, %s2719_s30, %s2720_s6  }
  0x14   :  { %s2645_s11 = scalar_lea.hbm %s3381_s0, 256 }
  0x15   :  { %p2646_p8 = scmp.ne.s32.totalorder %s3381_s0, %s2645_s11  ;;  %p2649_p9 = scmp.lt.u32.totalorder %s2645_s11, %s3381_s0 }
  0x17   :  { %p2651_p10 = pnand %p2649_p9, %p2646_p8 }
  0x19   :  { %2654 = shalt.err (!%p2651_p10)
}
  0x1a   :  { %s2655_s16 = scalar_lea.vmem %s2753_s21, 256  ;;  %p2660_p12 = scmp.lt.s32.totalorder %s2753_s21, %s2753_s21 }
  0x1b   :  { %p2656_p11 = scmp.ne.s32.totalorder %s2753_s21, %s2655_s16  ;;  %p2661_p13 = scmp.lt.s32.totalorder %s2655_s16, %s2655_s16 }
  0x1d   :  { %p2662_p0 = por %p2661_p13, %p2660_p12 }
  0x1f   :  { %p2663_p1 = pnand %p2662_p0, %p2656_p11 }
  0x21   :  { %2666 = shalt.err (!%p2663_p1)
}
  0x22   :  { %24 = dma.hbm_to_vmem [thread:$0]  %s3381_s0, 256, %s2753_s21, [#allocation4], %s2719_s30, %s2719_s30, %s2720_s6  }
  0x23   :  { %s2721_s18 = smov [#allocation8]   ;;  %s2667_s23 = scalar_lea.hbm %s3384_s3, 2048 }
  0x24   :  { %s44_s19 = sshll.u32 %s2721_s18, 4  ;;  %p2668_p2 = scmp.ne.s32.totalorder %s3384_s3, %s2667_s23  ;;  %s45_s19 = int_to_ptr.vmem [resolvable:$true] %s44_s19 }
  0x25   :  { %p2671_p3 = scmp.lt.u32.totalorder %s2667_s23, %s3384_s3 }
  0x27   :  { %p2673_p4 = pnand %p2671_p3, %p2668_p2 }
  0x29   :  { %2676 = shalt.err (!%p2673_p4)
}
  0x2a   :  { %s2677_s28 = scalar_lea.vmem %s45_s19, 2048  ;;  %p2682_p6 = scmp.lt.s32.totalorder %s45_s19, %s45_s19 }
  0x2b   :  { %p2678_p5 = scmp.ne.s32.totalorder %s45_s19, %s2677_s28  ;;  %p2683_p7 = scmp.lt.s32.totalorder %s2677_s28, %s2677_s28 }
  0x2d   :  { %p2684_p8 = por %p2683_p7, %p2682_p6 }
  0x2f   :  { %p2685_p9 = pnand %p2684_p8, %p2678_p5 }
  0x31   :  { %2688 = shalt.err (!%p2685_p9)
}
  0x32   :  { %50 = dma.hbm_to_vmem [thread:$0]  %s3384_s3, 2048, %s45_s19, [#allocation7], %s2719_s30, %s2719_s30, %s2720_s6  }
  0x33   :  { %2711 = dma.done.wait [#allocation4], 256  }
  0x34   :  { %2712 = vsyncadd [#allocation4], 4294967040 }
  0x35   :  { %2713 = dma.done.wait [#allocation7], 4096  }
  0x36   :  { %2714 = vsyncadd [#allocation7], 4294963200  ;;  %v70_v0 = vld [vmem:[#allocation6] sm:$0xff]  ;;  %v71_v1 = vld [vmem:[#allocation6 + $0x8] sm:$0xff]  ;;  %s2722_s8 = smov [#allocation9]  }
  0x37   :  { %v72_v2 = vld [vmem:[#allocation6 + $0x10] sm:$0xff]  ;;  %v94_v3 = vand.u32 4294901760, %v70_v0  ;;  %v97_v4 = vand.u32 4294901760, %v71_v1  ;;  %v73_v5 = vld [vmem:[#allocation6 + $0x18] sm:$0xff]  ;;  %v74_v7 = vld [vmem:[#allocation6 + $0x20] sm:$0xff]  ;;  %s1552_s9 = sshll.u32 %s2722_s8, 4  ;;  %s1553_s9 = int_to_ptr.vmem [resolvable:$true] %s1552_s9 }
  0x38   :  { %v100_v6 = vand.u32 4294901760, %v72_v2  ;;  %v75_v8 = vld [vmem:[#allocation6 + $0x28] sm:$0xff]  ;;  %v103_v9 = vand.u32 4294901760, %v73_v5  ;;  %v106_v11 = vand.u32 4294901760, %v74_v7  ;;  %v2809_v14 = vld [vmem:[#allocation6 + $0x30] sm:$0xff]  ;;  %v2811_v15 = vld [vmem:[#allocation6 + $0x38] sm:$0xff]  ;;  %p2694_p11 = scmp.lt.s32.totalorder %s1553_s9, %s1553_s9 }
  0x39   :  { %v2805_v10 = vpack.c.bf16 %v97_v4, %v94_v3  ;;  %v109_v12 = vand.u32 4294901760, %v75_v8  ;;  %v68_v16 = vld [vmem:[#allocation3] sm:$0xff]  ;;  %v112_v19 = vand.u32 4294901760, %v2809_v14  ;;  %v115_v20 = vand.u32 4294901760, %v2811_v15  ;;  %v78_v21 = vld [vmem:[#allocation6 + $0x40] sm:$0xff]  ;;  %v79_v22 = vld [vmem:[#allocation6 + $0x48] sm:$0xff] }
  0x3a   :  { %v2807_v13 = vpack.c.bf16 %v103_v9, %v100_v6  ;;  %v2815_v17 = vand.u32 4294901760, %v68_v16  ;;  %v2827_v25 = vsub.f32 %v70_v0, %v94_v3  ;;  %v118_v27 = vand.u32 4294901760, %v78_v21  ;;  %v69_v29 = vld [vmem:[#allocation3 + $0x8] sm:$0xff]  ;;  %v80_v30 = vld [vmem:[#allocation6 + $0x50] sm:$0xff]  ;;  %v82_v33 = vld [vmem:[#allocation6 + $0x60] sm:$0xff]  ;;  %s2689_s10 = scalar_lea.vmem %s1553_s9, 256 }
  0x3b   :  { %2204 = vmatprep.subr.bf16.mxu0 %v2805_v10  ;;  %v2818_v18 = vpack.c.bf16 %v109_v12, %v106_v11  ;;  %v2830_v26 = vpack.c.bf16 %v115_v20, %v112_v19  ;;  %v121_v28 = vand.u32 4294901760, %v79_v22  ;;  %v81_v31 = vld [vmem:[#allocation6 + $0x58] sm:$0xff]  ;;  %v83_v34 = vld [vmem:[#allocation6 + $0x68] sm:$0xff]  ;;  %v84_v35 = vld [vmem:[#allocation6 + $0x70] sm:$0xff]  ;;  %v2835_v36 = vsub.f32 %v71_v1, %v97_v4  ;;  %p2690_p10 = scmp.ne.s32.totalorder %s1553_s9, %s2689_s10  ;;  %p2695_p12 = scmp.lt.s32.totalorder %s2689_s10, %s2689_s10 }
  0x3c   :  { %2206 = vmatpush3.bf16.msra.mxu0 %v2805_v10  ;;  %v2823_v23 = vsub.f32 %v68_v16, %v2815_v17  ;;  %v85_v37 = vld [vmem:[#allocation6 + $0x78] sm:$0xff]  ;;  %v197_v39 = vand.u32 4294901760, %v2827_v25  ;;  %v2839_v40 = vand.u32 4294901760, %v69_v29  ;;  %v2841_v41 = vsub.f32 %v72_v2, %v100_v6 }
  0x3d   :  { %2208 = vmatprep.subr.bf16.mxu0 %v2807_v13  ;;  %v2844_v42 = vpack.c.bf16 %v121_v28, %v118_v27  ;;  %v124_v43 = vand.u32 4294901760, %v80_v30  ;;  %v127_v44 = vand.u32 4294901760, %v81_v31  ;;  %v130_v45 = vand.u32 4294901760, %v82_v33  ;;  %p2696_p13 = por %p2695_p12, %p2694_p11 }
  0x3e   :  { %v176_v24 = vand.u32 4294901760, %v2823_v23  ;;  %v133_v46 = vand.u32 4294901760, %v83_v34  ;;  %v136_v47 = vand.u32 4294901760, %v84_v35  ;;  %v139_v48 = vand.u32 4294901760, %v85_v37 }
  0x3f   :  { %v204_v49 = vand.u32 4294901760, %v2835_v36  ;;  %v2847_v50 = vsub.f32 %v73_v5, %v103_v9  ;;  %v2849_v51 = vsub.f32 %v74_v7, %v106_v11  ;;  %v198_v52 = vsub.f32 %v2827_v25, %v197_v39  ;;  %p2697_p0 = pnand %p2696_p13, %p2690_p10 }
  0x40   :  { %2210 = vmatpush3.bf16.msra.mxu0 %v2807_v13  ;;  %v177_v32 = vsub.f32 %v2823_v23, %v176_v24  ;;  %v2854_v53 = vsub.f32 %v69_v29, %v2839_v40  ;;  %v211_v54 = vand.u32 4294901760, %v2841_v41  ;;  %v2857_v55 = vsub.f32 %v75_v8, %v109_v12 }
  0x41   :  { %2212 = vmatprep.subr.bf16.mxu0 %v2818_v18  ;;  %v2860_v56 = vpack.c.bf16 %v127_v44, %v124_v43  ;;  %v2862_v57 = vpack.c.bf16 %v133_v46, %v130_v45  ;;  %v2864_v58 = vpack.c.bf16 %v139_v48, %v136_v47  ;;  %v205_v59 = vsub.f32 %v2835_v36, %v204_v49 }
  0x42   :  { %v178_v38 = vand.u32 4294901760, %v177_v32  ;;  %v218_v60 = vand.u32 4294901760, %v2847_v50  ;;  %v225_v61 = vand.u32 4294901760, %v2849_v51  ;;  %v199_v62 = vand.u32 4294901760, %v198_v52 }
  0x43   :  { %v186_v63 = vand.u32 4294901760, %v2854_v53  ;;  %v212_v0 = vsub.f32 %v2841_v41, %v211_v54  ;;  %v232_v1 = vand.u32 4294901760, %v2857_v55  ;;  %v2875_v2 = vsub.f32 %v2809_v14, %v112_v19 }
  0x44   :  { %2214 = vmatpush3.bf16.msra.mxu0 %v2818_v18  ;;  %1815 = vmatprep.mubr.f32.mxu0 %v178_v38  ;;  %v2878_v3 = vsub.f32 %v2811_v15, %v115_v20  ;;  %v2880_v4 = vsub.f32 %v78_v21, %v118_v27  ;;  %v2882_v5 = vsub.f32 %v79_v22, %v121_v28  ;;  %v206_v11 = vand.u32 4294901760, %v205_v59 }
  0x45   :  { %2216 = vmatprep.subr.bf16.mxu0 %v2830_v26  ;;  %v2884_v6 = vsub.f32 %v80_v30, %v124_v43  ;;  %v2886_v7 = vsub.f32 %v81_v31, %v127_v44  ;;  %v2888_v8 = vsub.f32 %v82_v33, %v130_v45  ;;  %v2890_v9 = vsub.f32 %v83_v34, %v133_v46 }
  0x46   :  { %v219_v12 = vsub.f32 %v2847_v50, %v218_v60  ;;  %v2893_v14 = vsub.f32 %v84_v35, %v136_v47  ;;  %v2895_v16 = vsub.f32 %v85_v37, %v139_v48  ;;  %v187_v15 = vsub.f32 %v2854_v53, %v186_v63 }
  0x47   :  { %v213_v19 = vand.u32 4294901760, %v212_v0  ;;  %v226_v20 = vsub.f32 %v2849_v51, %v225_v61  ;;  %v233_v21 = vsub.f32 %v2857_v55, %v232_v1  ;;  %v239_v22 = vand.u32 4294901760, %v2875_v2 }
  0x48   :  { %2218 = vmatpush3.bf16.msra.mxu0 %v2830_v26  ;;  %v246_v27 = vand.u32 4294901760, %v2878_v3  ;;  %v253_v28 = vand.u32 4294901760, %v2880_v4  ;;  %v260_v29 = vand.u32 4294901760, %v2882_v5  ;;  %v267_v30 = vand.u32 4294901760, %v2884_v6 }
  0x49   :  { %2220 = vmatprep.subr.bf16.mxu0 %v2844_v42  ;;  %v274_v31 = vand.u32 4294901760, %v2886_v7  ;;  %v281_v32 = vand.u32 4294901760, %v2888_v8  ;;  %v288_v33 = vand.u32 4294901760, %v2890_v9  ;;  %v295_v34 = vand.u32 4294901760, %v2893_v14 }
  0x4a   :  { %v302_v35 = vand.u32 4294901760, %v2895_v16  ;;  %v2914_v37 = vpack.c.bf16 %v204_v49, %v197_v39  ;;  %v2916_v38 = vpack.c.bf16 %v218_v60, %v211_v54  ;;  %v2235_v43 = vpack.c.bf16 %v206_v11, %v199_v62 }
  0x4b   :  { %v2919_v44 = vpack.c.bf16 %v232_v1, %v225_v61  ;;  %v2921_v45 = vpack.c.bf16 %v246_v27, %v239_v22  ;;  %v2923_v46 = vpack.c.bf16 %v260_v29, %v253_v28  ;;  %v220_v47 = vand.u32 4294901760, %v219_v12 }
  0x4c   :  { %2222 = vmatpush3.bf16.msra.mxu0 %v2844_v42  ;;  %v2926_v48 = vpack.c.bf16 %v274_v31, %v267_v30  ;;  %v2928_v52 = vpack.c.bf16 %v288_v33, %v281_v32  ;;  %v2930_v39 = vpack.c.bf16 %v302_v35, %v295_v34  ;;  %v188_v49 = vand.u32 4294901760, %v187_v15 }
  0x4d   :  { %2224 = vmatprep.subr.bf16.mxu0 %v2860_v56  ;;  %v227_v54 = vand.u32 4294901760, %v226_v20  ;;  %v234_v59 = vand.u32 4294901760, %v233_v21  ;;  %v2239_v60 = vpack.c.bf16 %v220_v47, %v213_v19  ;;  %v240_v61 = vsub.f32 %v2875_v2, %v239_v22 }
  0x4e   :  { %v247_v62 = vsub.f32 %v2878_v3, %v246_v27  ;;  %v254_v12 = vsub.f32 %v2880_v4, %v253_v28  ;;  %v261_v15 = vsub.f32 %v2882_v5, %v260_v29  ;;  %v268_v20 = vsub.f32 %v2884_v6, %v267_v30 }
  0x4f   :  { %v2243_v0 = vpack.c.bf16 %v234_v59, %v227_v54  ;;  %v241_v1 = vand.u32 4294901760, %v240_v61  ;;  %v275_v27 = vsub.f32 %v2886_v7, %v274_v31  ;;  %v289_v28 = vsub.f32 %v2890_v9, %v288_v33 }
  0x50   :  { %2226 = vmatpush3.bf16.msra.mxu0 %v2860_v56  ;;  %v248_v11 = vand.u32 4294901760, %v247_v62  ;;  %v255_v21 = vand.u32 4294901760, %v254_v12  ;;  %v262_v22 = vand.u32 4294901760, %v261_v15  ;;  %v303_v61 = vsub.f32 %v2895_v16, %v302_v35 }
  0x51   :  { %2228 = vmatprep.subr.bf16.mxu0 %v2862_v57  ;;  %v276_v54 = vand.u32 4294901760, %v275_v27  ;;  %v290_v30 = vand.u32 4294901760, %v289_v28  ;;  %v2267_v33 = vpack.c.bf16 %v2835_v36, %v2827_v25  ;;  %v2275_v35 = vpack.c.bf16 %v2857_v55, %v2849_v51  ;;  %v831_v55 = vld [vmem:[#allocation8 + $0x20] sm:$0xff] }
  0x52   :  { %v2247_v19 = vpack.c.bf16 %v248_v11, %v241_v1  ;;  %v2251_v47 = vpack.c.bf16 %v262_v22, %v255_v21  ;;  %v2279_v1 = vpack.c.bf16 %v2878_v3, %v2875_v2  ;;  %v2283_v25 = vpack.c.bf16 %v2882_v5, %v2880_v4  ;;  %v834_v2 = vld [vmem:[#allocation8 + $0x38] sm:$0xff] }
  0x53   :  { %v2287_v36 = vpack.c.bf16 %v2886_v7, %v2884_v6  ;;  %v865_v4 = vand.u32 4294901760, %v834_v2  ;;  %v3033_v6 = vld [vmem:[#allocation8 + $0x40] sm:$0xff]  ;;  %v3035_v7 = vld [vmem:[#allocation8 + $0x48] sm:$0xff] }
  0x54   :  { %2230 = vmatpush3.bf16.msra.mxu0 %v2862_v57 }
  0x55   :  { %2232 = vmatprep.subr.bf16.mxu0 %v2864_v58 }
  0x58   :  { %2234 = vmatpush3.bf16.msra.mxu0 %v2864_v58 }
  0x59   :  { %2236 = vmatprep.subr.bf16.mxu0 %v2235_v43 }
  0x5b   :  { %1816 = vmatmul.mubr.f32.vlgmr.msra.gmra.mrb[0].mxu0 %v188_v49  ;;  %v269_v49 = vand.u32 4294901760, %v268_v20  ;;  %v3071_v20 = vld [vmem:[#allocation8 + $0x70] sm:$0xff] }
  0x5c   :  { %2238 = vmatpush3.bf16.msra.mxu0 %v2235_v43  ;;  %1850 = vmatprep.mubr.f32.mxu0 %v2815_v17  ;;  %v282_v43 = vsub.f32 %v2888_v8, %v281_v32  ;;  %v304_v32 = vand.u32 4294901760, %v303_v61  ;;  %v886_v21 = vand.u32 4294901760, %v3071_v20 }
  0x5d   :  { %2240 = vmatprep.subr.bf16.mxu0 %v2239_v60  ;;  %v2255_v59 = vpack.c.bf16 %v276_v54, %v269_v49 }
  0x5e   :  { %v283_v29 = vand.u32 4294901760, %v282_v43 }
  0x60   :  { %2242 = vmatpush3.bf16.msra.mxu0 %v2239_v60  ;;  %v296_v60 = vsub.f32 %v2893_v14, %v295_v34  ;;  %v2259_v31 = vpack.c.bf16 %v290_v30, %v283_v29  ;;  %v2271_v34 = vpack.c.bf16 %v2847_v50, %v2841_v41  ;;  %v2291_v41 = vpack.c.bf16 %v2890_v9, %v2888_v8 }
  0x61   :  { %2244 = vmatprep.subr.bf16.mxu0 %v2243_v0  ;;  %v2295_v50 = vpack.c.bf16 %v2895_v16, %v2893_v14  ;;  %v868_v8 = vand.u32 4294901760, %v3033_v6  ;;  %v871_v9 = vand.u32 4294901760, %v3035_v7  ;;  %v3043_v16 = vld [vmem:[#allocation8 + $0x50] sm:$0xff] }
  0x62   :  { %v297_v62 = vand.u32 4294901760, %v296_v60 }
  0x63   :  { %v3041_v14 = vpack.c.bf16 %v871_v9, %v868_v8 }
  0x64   :  { %2246 = vmatpush3.bf16.msra.mxu0 %v2243_v0  ;;  %v2263_v0 = vpack.c.bf16 %v304_v32, %v297_v62 }
  0x65   :  { %2248 = vmatprep.subr.bf16.mxu0 %v2247_v19 }
  0x68   :  { %2250 = vmatpush3.bf16.msra.mxu0 %v2247_v19  ;;  %v3073_v19 = vld [vmem:[#allocation8 + $0x78] sm:$0xff] }
  0x69   :  { %2252 = vmatprep.subr.bf16.mxu0 %v2251_v47  ;;  %v889_v22 = vand.u32 4294901760, %v3073_v19 }
  0x6c   :  { %2254 = vmatpush3.bf16.msra.mxu0 %v2251_v47  ;;  %v3085_v47 = vpack.c.bf16 %v889_v22, %v886_v21 }
  0x6d   :  { %2256 = vmatprep.subr.bf16.mxu0 %v2255_v59 }
  0x70   :  { %2258 = vmatpush3.bf16.msra.mxu0 %v2255_v59 }
  0x71   :  { %2260 = vmatprep.subr.bf16.mxu0 %v2259_v31 }
  0x74   :  { %2262 = vmatpush3.bf16.msra.mxu0 %v2259_v31 }
  0x75   :  { %2264 = vmatprep.subr.bf16.mxu0 %v2263_v0 }
  0x78   :  { %2266 = vmatpush3.bf16.msra.mxu0 %v2263_v0 }
  0x79   :  { %2268 = vmatprep.subr.bf16.mxu0 %v2267_v33 }
  0x7b   :  { %1851 = vmatmul.mubr.f32.vlgmr.msra.gmra.mrb[0].mxu0 %v2839_v40 }
  0x7c   :  { %2270 = vmatpush3.bf16.msra.mxu0 %v2267_v33  ;;  %1885 = vmatprep.mubr.f32.mxu0 %v2823_v23 }
  0x7d   :  { %2272 = vmatprep.subr.bf16.mxu0 %v2271_v34 }
  0x80   :  { %2274 = vmatpush3.bf16.msra.mxu0 %v2271_v34 }
  0x81   :  { %2276 = vmatprep.subr.bf16.mxu0 %v2275_v35 }
  0x84   :  { %2278 = vmatpush3.bf16.msra.mxu0 %v2275_v35 }
  0x85   :  { %2280 = vmatprep.subr.bf16.mxu0 %v2279_v1 }
  0x88   :  { %2282 = vmatpush3.bf16.msra.mxu0 %v2279_v1 }
  0x89   :  { %2284 = vmatprep.subr.bf16.mxu0 %v2283_v25 }
  0x8c   :  { %2286 = vmatpush3.bf16.msra.mxu0 %v2283_v25 }
  0x8d   :  { %2288 = vmatprep.subr.bf16.mxu0 %v2287_v36 }
  0x90   :  { %2290 = vmatpush3.bf16.msra.mxu0 %v2287_v36 }
  0x91   :  { %2292 = vmatprep.subr.bf16.mxu0 %v2291_v41 }
  0x94   :  { %2294 = vmatpush3.bf16.msra.mxu0 %v2291_v41 }
  0x95   :  { %2296 = vmatprep.subr.bf16.mxu0 %v2295_v50 }
  0x98   :  { %2298 = vmatpush3.bf16.msra.mxu0 %v2295_v50 }
  0x99   :  { %2300 = vmatprep.subr.bf16.mxu0 %v2805_v10 }
  0x9b   :  { %1886 = vmatmul.mubr.f32.vlgmr.msra.gmra.mrb[0].mxu0 %v2854_v53 }
  0x9c   :  { %2302 = vmatpush3.bf16.msra.mxu0 %v2805_v10  ;;  %1920 = vmatprep.mubr.f32.mxu0 %v176_v24  ;;  %v829_v24 = vld [vmem:[#allocation8 + $0x10] sm:$0xff] }
  0x9d   :  { %2304 = vmatprep.subr.bf16.mxu0 %v2807_v13 }
  0xa0   :  { %2306 = vmatpush3.bf16.msra.mxu0 %v2807_v13 }
  0xa1   :  { %2308 = vmatprep.subr.bf16.mxu0 %v2818_v18 }
  0xa4   :  { %2310 = vmatpush3.bf16.msra.mxu0 %v2818_v18 }
  0xa5   :  { %2312 = vmatprep.subr.bf16.mxu0 %v2830_v26 }
  0xa8   :  { %2314 = vmatpush3.bf16.msra.mxu0 %v2830_v26 }
  0xa9   :  { %2316 = vmatprep.subr.bf16.mxu0 %v2844_v42 }
  0xac   :  { %2318 = vmatpush3.bf16.msra.mxu0 %v2844_v42 }
  0xad   :  { %2320 = vmatprep.subr.bf16.mxu0 %v2860_v56 }
  0xb0   :  { %2322 = vmatpush3.bf16.msra.mxu0 %v2860_v56 }
  0xb1   :  { %2324 = vmatprep.subr.bf16.mxu0 %v2862_v57 }
  0xb4   :  { %2326 = vmatpush3.bf16.msra.mxu0 %v2862_v57 }
  0xb5   :  { %2328 = vmatprep.subr.bf16.mxu0 %v2864_v58 }
  0xb8   :  { %2330 = vmatpush3.bf16.msra.mxu0 %v2864_v58 }
  0xb9   :  { %2332 = vmatprep.subr.bf16.mxu0 %v2914_v37 }
  0xbb   :  { %1921 = vmatmul.mubr.f32.vlgmr.msra.gmra.mrb[0].mxu0 %v186_v63  ;;  %v833_v63 = vld [vmem:[#allocation8 + $0x30] sm:$0xff] }
  0xbc   :  { %2334 = vmatpush3.bf16.msra.mxu0 %v2914_v37  ;;  %1955 = vmatprep.mubr.f32.mxu0 %v2815_v17  ;;  %v862_v3 = vand.u32 4294901760, %v833_v63  ;;  %v3045_v37 = vld [vmem:[#allocation8 + $0x58] sm:$0xff] }
  0xbd   :  { %2336 = vmatprep.subr.bf16.mxu0 %v2916_v38 }
  0xbe   :  { %v3031_v5 = vpack.c.bf16 %v865_v4, %v862_v3 }
  0xc0   :  { %2338 = vmatpush3.bf16.msra.mxu0 %v2916_v38  ;;  %v874_v38 = vand.u32 4294901760, %v3043_v16 }
  0xc1   :  { %2340 = vmatprep.subr.bf16.mxu0 %v2919_v44 }
  0xc4   :  { %2342 = vmatpush3.bf16.msra.mxu0 %v2919_v44  ;;  %v877_v44 = vand.u32 4294901760, %v3045_v37 }
  0xc5   :  { %2344 = vmatprep.subr.bf16.mxu0 %v2921_v45 }
  0xc8   :  { %2346 = vmatpush3.bf16.msra.mxu0 %v2921_v45  ;;  %v3051_v45 = vpack.c.bf16 %v877_v44, %v874_v38 }
  0xc9   :  { %2348 = vmatprep.subr.bf16.mxu0 %v2923_v46 }
  0xcc   :  { %2350 = vmatpush3.bf16.msra.mxu0 %v2923_v46  ;;  %v3053_v46 = vld [vmem:[#allocation8 + $0x60] sm:$0xff] }
  0xcd   :  { %2352 = vmatprep.subr.bf16.mxu0 %v2926_v48 }
  0xd0   :  { %2354 = vmatpush3.bf16.msra.mxu0 %v2926_v48  ;;  %v3055_v48 = vld [vmem:[#allocation8 + $0x68] sm:$0xff] }
  0xd1   :  { %2356 = vmatprep.subr.bf16.mxu0 %v2928_v52 }
  0xd4   :  { %2358 = vmatpush3.bf16.msra.mxu0 %v2928_v52  ;;  %v880_v52 = vand.u32 4294901760, %v3053_v46 }
  0xd5   :  { %2360 = vmatprep.subr.bf16.mxu0 %v2930_v39 }
  0xd8   :  { %2362 = vmatpush3.bf16.msra.mxu0 %v2930_v39  ;;  %v883_v39 = vand.u32 4294901760, %v3055_v48 }
  0xd9   :  { %2364 = vmatprep.subr.bf16.mxu0 %v2805_v10 }
  0xda   :  { %v3065_v11 = vpack.c.bf16 %v883_v39, %v880_v52 }
  0xdb   :  { %1956 = vmatmul.mubr.f32.vlgmr.msra.gmra.mrb[0].mxu0 %v2839_v40 }
  0xdc   :  { %2366 = vmatpush3.bf16.msra.mxu0 %v2805_v10  ;;  %1990 = vmatprep.mubr.f32.mxu0 %v2815_v17  ;;  %v827_v10 = vld [vmem:[#allocation8] sm:$0xff] }
  0xdd   :  { %2368 = vmatprep.subr.bf16.mxu0 %v2807_v13  ;;  %v844_v17 = vand.u32 4294901760, %v827_v10 }
  0xdf   :  { %v3067_v12 = vsub.f32 %v827_v10, %v844_v17  ;;  %v3124_v10 = vsub.f32 %v833_v63, %v862_v3 }
  0xe0   :  { %2370 = vmatpush3.bf16.msra.mxu0 %v2807_v13  ;;  %v828_v13 = vld [vmem:[#allocation8 + $0x8] sm:$0xff] }
  0xe1   :  { %2372 = vmatprep.subr.bf16.mxu0 %v2818_v18  ;;  %v3402_v27 = vand.u32 4294901760, %v3067_v12 }
  0xe3   :  { %v948_v49 = vsub.f32 %v3067_v12, %v3402_v27 }
  0xe4   :  { %2374 = vmatpush3.bf16.msra.mxu0 %v2818_v18  ;;  %v847_v18 = vand.u32 4294901760, %v828_v13 }
  0xe5   :  { %2376 = vmatprep.subr.bf16.mxu0 %v2830_v26  ;;  %v949_v59 = vand.u32 4294901760, %v948_v49 }
  0xe6   :  { %v3019_v23 = vpack.c.bf16 %v847_v18, %v844_v17  ;;  %v3069_v15 = vsub.f32 %v828_v13, %v847_v18  ;;  %v3126_v13 = vsub.f32 %v834_v2, %v865_v4 }
  0xe8   :  { %2378 = vmatpush3.bf16.msra.mxu0 %v2830_v26  ;;  %v830_v26 = vld [vmem:[#allocation8 + $0x18] sm:$0xff]  ;;  %2396 = vmatprep.subr.bf16.mxu1 %v3019_v23  ;;  %v3401_v43 = vand.u32 4294901760, %v3069_v15 }
  0xe9   :  { %2380 = vmatprep.subr.bf16.mxu0 %v2844_v42  ;;  %v853_v51 = vand.u32 4294901760, %v830_v26  ;;  %2398 = vmatpush3.bf16.msra.mxu1 %v3019_v23 }
  0xea   :  { %v955_v54 = vsub.f32 %v3069_v15, %v3401_v43 }
  0xeb   :  { %v3095_v29 = vsub.f32 %v830_v26, %v853_v51  ;;  %v3395_v26 = vand.u32 4294901760, %v3126_v13 }
  0xec   :  { %2382 = vmatpush3.bf16.msra.mxu0 %v2844_v42  ;;  %v850_v42 = vand.u32 4294901760, %v829_v24  ;;  %v956_v30 = vand.u32 4294901760, %v955_v54 }
  0xed   :  { %2384 = vmatprep.subr.bf16.mxu0 %v2860_v56  ;;  %v3399_v61 = vand.u32 4294901760, %v3095_v29 }
  0xee   :  { %v3023_v53 = vpack.c.bf16 %v853_v51, %v850_v42  ;;  %v3093_v28 = vsub.f32 %v829_v24, %v850_v42  ;;  %v3101_v31 = vpack.c.bf16 %v956_v30, %v949_v59  ;;  %v3396_v24 = vand.u32 4294901760, %v3124_v10 }
  0xef   :  { %v969_v32 = vsub.f32 %v3095_v29, %v3399_v61 }
  0xf0   :  { %2386 = vmatpush3.bf16.msra.mxu0 %v2860_v56  ;;  %v832_v56 = vld [vmem:[#allocation8 + $0x28] sm:$0xff]  ;;  %2400 = vmatprep.subr.bf16.mxu1 %v3023_v53  ;;  %v3400_v60 = vand.u32 4294901760, %v3093_v28  ;;  %v990_v51 = vsub.f32 %v3124_v10, %v3396_v24 }
  0xf1   :  { %2388 = vmatprep.subr.bf16.mxu0 %v2862_v57  ;;  %2402 = vmatpush3.bf16.msra.mxu1 %v3023_v53  ;;  %v970_v35 = vand.u32 4294901760, %v969_v32 }
  0xf2   :  { %v962_v62 = vsub.f32 %v3093_v28, %v3400_v60 }
  0xf4   :  { %2390 = vmatpush3.bf16.msra.mxu0 %v2862_v57  ;;  %v859_v57 = vand.u32 4294901760, %v832_v56  ;;  %v963_v34 = vand.u32 4294901760, %v962_v62 }
  0xf5   :  { %2392 = vmatprep.subr.bf16.mxu0 %v2864_v58 }
  0xf6   :  { %v3111_v33 = vsub.f32 %v832_v56, %v859_v57  ;;  %v3116_v36 = vpack.c.bf16 %v970_v35, %v963_v34  ;;  %v3139_v56 = vsub.f32 %v3035_v7, %v871_v9  ;;  %v3153_v7 = vsub.f32 %v3043_v16, %v874_v38 }
  0xf7   :  { %v3178_v38 = vsub.f32 %v3055_v48, %v883_v39  ;;  %v3195_v48 = vsub.f32 %v3073_v19, %v889_v22 }
  0xf8   :  { %2394 = vmatpush3.bf16.msra.mxu0 %v2864_v58  ;;  %v3397_v25 = vand.u32 4294901760, %v3111_v33  ;;  %v3393_v2 = vand.u32 4294901760, %v3139_v56  ;;  %v3392_v59 = vand.u32 4294901760, %v3153_v7 }
  0xf9   :  { %3408 = vst [vmem:[#allocation14_spill] sm:$0xff] %v3178_v38  ;;  %3410 = vst [vmem:[#allocation16_spill] sm:$0xff] %v3195_v48 }
  0xfa   :  { %v983_v50 = vsub.f32 %v3111_v33, %v3397_v25  ;;  %v1018_v32 = vsub.f32 %v3153_v7, %v3392_v59 }
  0xfb   :  { %1991 = vmatmul.mubr.f32.vlgmr.msra.gmra.mrb[0].mxu0 %v2839_v40  ;;  %v856_v40 = vand.u32 4294901760, %v831_v55 }
  0xfc   :  { %v984_v18 = vand.u32 4294901760, %v983_v50 }
  0xfd   :  { %v3027_v58 = vpack.c.bf16 %v859_v57, %v856_v40  ;;  %v3109_v0 = vsub.f32 %v831_v55, %v856_v40  ;;  %v3136_v55 = vsub.f32 %v3033_v6, %v868_v8  ;;  %v997_v40 = vsub.f32 %v3126_v13, %v3395_v26 }
  0xfe   :  { %v991_v57 = vand.u32 4294901760, %v990_v51  ;;  %v1011_v6 = vsub.f32 %v3139_v56, %v3393_v2  ;;  %v3156_v8 = vsub.f32 %v3045_v37, %v877_v44  ;;  %v3173_v37 = vsub.f32 %v3053_v46, %v880_v52 }
  0xff   :  { %2404 = vmatprep.subr.bf16.mxu1 %v3027_v58  ;;  %v3398_v1 = vand.u32 4294901760, %v3109_v0  ;;  %v3394_v63 = vand.u32 4294901760, %v3136_v55  ;;  %v998_v3 = vand.u32 4294901760, %v997_v40  ;;  %v1019_v44 = vand.u32 4294901760, %v1018_v32 }
 0x100   :  { %2406 = vmatpush3.bf16.msra.mxu1 %v3027_v58  ;;  %v1012_v54 = vand.u32 4294901760, %v1011_v6  ;;  %v3391_v30 = vand.u32 4294901760, %v3156_v8  ;;  %3407 = vst [vmem:[#allocation13_spill] sm:$0xff] %v3173_v37  ;;  %v3390_v35 = vand.u32 4294901760, %v3173_v37  ;;  %v3190_v46 = vsub.f32 %v3071_v20, %v886_v21 }
 0x101   :  { %2408 = vmatprep.subr.bf16.mxu1 %v3031_v5  ;;  %v976_v41 = vsub.f32 %v3109_v0, %v3398_v1  ;;  %v1004_v4 = vsub.f32 %v3136_v55, %v3394_v63  ;;  %v3158_v9 = vpack.c.bf16 %v998_v3, %v991_v57  ;;  %v3387_v51 = vand.u32 4294901760, %v3195_v48 }
 0x102   :  { %v1025_v16 = vsub.f32 %v3156_v8, %v3391_v30  ;;  %3409 = vst [vmem:[#allocation15_spill] sm:$0xff] %v3190_v46  ;;  %v3218_v6 = vpack.c.bf16 %v3095_v29, %v3093_v28  ;;  %v3230_v32 = vpack.c.bf16 %v3139_v56, %v3136_v55 }
 0x103   :  { %v977_v17 = vand.u32 4294901760, %v976_v41  ;;  %v1005_v49 = vand.u32 4294901760, %v1004_v4  ;;  %v3389_v41 = vand.u32 4294901760, %v3178_v38  ;;  %v1053_v21 = vsub.f32 %v3195_v48, %v3387_v51 }
 0x104   :  { %2410 = vmatpush3.bf16.msra.mxu1 %v3031_v5  ;;  %v1026_v34 = vand.u32 4294901760, %v1025_v16  ;;  %v3214_v4 = vpack.c.bf16 %v3069_v15, %v3067_v12  ;;  %v3234_v16 = vpack.c.bf16 %v3156_v8, %v3153_v7 }
 0x105   :  { %2412 = vmatprep.subr.bf16.mxu1 %v3041_v14  ;;  %v3130_v42 = vpack.c.bf16 %v984_v18, %v977_v17  ;;  %v3162_v62 = vpack.c.bf16 %v1012_v54, %v1005_v49  ;;  %v1032_v17 = vsub.f32 %v3173_v37, %v3390_v35  ;;  %v1039_v52 = vsub.f32 %v3178_v38, %v3389_v41 }
 0x106   :  { %v3182_v50 = vpack.c.bf16 %v1026_v34, %v1019_v44  ;;  %v3388_v18 = vand.u32 4294901760, %v3190_v46  ;;  %v1054_v57 = vand.u32 4294901760, %v1053_v21  ;;  %v3222_v49 = vpack.c.bf16 %v3111_v33, %v3109_v0 }
 0x107   :  { %v1033_v39 = vand.u32 4294901760, %v1032_v17  ;;  %v1040_v40 = vand.u32 4294901760, %v1039_v52  ;;  %v3226_v54 = vpack.c.bf16 %v3126_v13, %v3124_v10  ;;  %v3238_v44 = vpack.c.bf16 %v3178_v38, %v3173_v37  ;;  %v1565_v17 = vld [vmem:[%s3383_s2] ss:$0 sm:$0xff] }
 0x108   :  { %2414 = vmatpush3.bf16.msra.mxu1 %v3041_v14  ;;  %v1046_v20 = vsub.f32 %v3190_v46, %v3388_v18  ;;  %v3242_v34 = vpack.c.bf16 %v3195_v48, %v3190_v46 }
 0x109   :  { %2416 = vmatprep.subr.bf16.mxu1 %v3051_v45  ;;  %v3208_v19 = vpack.c.bf16 %v1040_v40, %v1033_v39 }
 0x10a   :  { %v1047_v22 = vand.u32 4294901760, %v1046_v20 }
 0x10c   :  { %2418 = vmatpush3.bf16.msra.mxu1 %v3051_v45  ;;  %v3210_v3 = vpack.c.bf16 %v1054_v57, %v1047_v22 }
 0x10d   :  { %2420 = vmatprep.subr.bf16.mxu1 %v3065_v11 }
 0x110   :  { %2422 = vmatpush3.bf16.msra.mxu1 %v3065_v11 }
 0x111   :  { %2424 = vmatprep.subr.bf16.mxu1 %v3085_v47 }
 0x114   :  { %2426 = vmatpush3.bf16.msra.mxu1 %v3085_v47 }
 0x115   :  { %2428 = vmatprep.subr.bf16.mxu1 %v3101_v31 }
 0x1ce   :  { %v1992_v52 = vpop.f32.mrb[0].mxu0 }
 0x1cf   :  { %v2587_v39 = vadd.f32 %v1992_v52, %v1565_v17  ;;  %v767_v40 = vpop.f32.mrb[1].mxu0 }
 0x1d0   :  { %v2588_v20 = vadd.f32 %v1565_v17, %v767_v40 }
 0x1d1   :  { %v778_v21 = vand.u32 2147483647, %v2587_v39 }
 0x1d2   :  { %v777_v22 = vand.u32 2147483647, %v2588_v20 }
 0x1d3   :  { %v780_v57 = vmul.f32 0.70710677, %v778_v21 }
 0x1d4   :  { %v779_v51 = vmul.f32 0.70710677, %v777_v22 }
 0x1d5   :  { %v782_v18 = vmul.f32 0.3275911, %v780_v57  ;;  %v806_v59 = vmul.f32 %v780_v57, %v780_v57 }
 0x1d6   :  { %v781_v41 = vmul.f32 0.3275911, %v779_v51  ;;  %v805_v2 = vmul.f32 %v779_v51, %v779_v51 }
 0x1d7   :  { %v784_v35 = vadd.f32 1.0, %v782_v18  ;;  %v808_v26 = vsub.f32 0.0, %v806_v59 }
 0x1d8   :  { %v783_v30 = vadd.f32 1.0, %v781_v41  ;;  %v807_v1 = vsub.f32 0.0, %v805_v2 }
 0x1d9   :  { %2615 = vrcp.f32 %v784_v35  ;;  %v811_v17 = vmul.f32 1.442695, %v808_v26 }
 0x1da   :  { %2617 = vrcp.f32 %v783_v30  ;;  %v809_v43 = vmul.f32 1.442695, %v807_v1 }
 0x1db   :  { %2619 = vpow2.f32 %v811_v17  ;;  %v819_v17 = vmul.f32 0.5, %v777_v22 }
 0x1dc   :  { %2621 = vpow2.f32 %v809_v43  ;;  %v817_v43 = vmul.f32 0.5, %v2588_v20 }
 0x1e3   :  { %v2616_v63 = vpop.eup %2615 }
 0x1e4   :  { %v2618_v24 = vpop.eup %2617  ;;  %v788_v25 = vmul.f32 1.0614054, %v2616_v63 }
 0x1e5   :  { %v787_v52 = vmul.f32 1.0614054, %v2618_v24  ;;  %v2620_v37 = vpop.eup %2619 }
 0x1e6   :  { %v790_v61 = vadd.f32 -1.4531521, %v788_v25  ;;  %v2622_v26 = vpop.eup %2621 }
 0x1e7   :  { %v789_v40 = vadd.f32 -1.4531521, %v787_v52 }
 0x1e8   :  { %v792_v60 = vmul.f32 %v2616_v63, %v790_v61 }
 0x1e9   :  { %v791_v27 = vmul.f32 %v2618_v24, %v789_v40  ;;  %v820_v40 = vmul.f32 0.5, %v778_v21 }
 0x1ea   :  { %v794_v48 = vadd.f32 1.4214138, %v792_v60 }
 0x1eb   :  { %v793_v18 = vadd.f32 1.4214138, %v791_v27  ;;  %v818_v27 = vmul.f32 0.5, %v2587_v39 }
 0x1ec   :  { %v796_v41 = vmul.f32 %v2616_v63, %v794_v48 }
 0x1ed   :  { %v795_v30 = vmul.f32 %v2618_v24, %v793_v18 }
 0x1ee   :  { %v798_v35 = vadd.f32 -0.28449672, %v796_v41 }
 0x1ef   :  { %v797_v51 = vadd.f32 -0.28449672, %v795_v30 }
 0x1f0   :  { %v800_v57 = vmul.f32 %v2616_v63, %v798_v35 }
 0x1f1   :  { %v799_v59 = vmul.f32 %v2618_v24, %v797_v51 }
 0x1f2   :  { %v802_v46 = vadd.f32 0.2548296, %v800_v57 }
 0x1f3   :  { %v801_v38 = vadd.f32 0.2548296, %v799_v59 }
 0x1f4   :  { %v804_v2 = vmul.f32 %v2616_v63, %v802_v46 }
 0x1f5   :  { %v803_v25 = vmul.f32 %v2618_v24, %v801_v38 }
 0x1f6   :  { %v814_v52 = vmul.f32 %v2620_v37, %v804_v2 }
 0x1f7   :  { %v813_v61 = vmul.f32 %v2622_v26, %v803_v25 }
 0x1f8   :  { %v816_v1 = vsub.f32 1.0, %v814_v52 }
 0x1f9   :  { %v815_v60 = vsub.f32 1.0, %v813_v61 }
 0x1fa   :  { %v822_v48 = vmul.f32 %v820_v40, %v816_v1 }
 0x1fb   :  { %v821_v18 = vmul.f32 %v819_v17, %v815_v60 }
 0x1fc   :  { %v824_v41 = vadd.f32 %v822_v48, %v818_v27 }
 0x1fd   :  { %v823_v30 = vadd.f32 %v821_v18, %v817_v43 }
 0x1fe   :  { %v3247_v35 = vand.u32 4294901760, %v824_v41 }
 0x1ff   :  { %v3249_v51 = vand.u32 4294901760, %v823_v30 }
 0x200   :  { %v3252_v63 = vsub.f32 %v824_v41, %v3247_v35 }
 0x201   :  { %v925_v24 = vsub.f32 %v823_v30, %v3249_v51 }
 0x202   :  { %v936_v37 = vand.u32 4294901760, %v3252_v63 }
 0x203   :  { %v926_v38 = vand.u32 4294901760, %v925_v24 }
 0x204   :  { %v937_v46 = vsub.f32 %v3252_v63, %v936_v37 }
 0x205   :  { %v927_v39 = vsub.f32 %v925_v24, %v926_v38 }
 0x206   :  { %v938_v21 = vand.u32 4294901760, %v937_v46 }
 0x207   :  { %v928_v20 = vand.u32 4294901760, %v927_v39 }
 0x209   :  { %2025 = vmatprep.mubr.f32.mxu1 %v928_v20 }
 0x20a   :  { %2026 = vmatmul.mubr.f32.vlgmr.msra.gmra.mrb[0].mxu1 %v938_v21 }
 0x20b   :  { %2430 = vmatpush3.bf16.msra.mxu1 %v3101_v31  ;;  %2060 = vmatprep.mubr.f32.mxu1 %v3249_v51  ;;  %v3411_v31 = vand.u32 4294901760, %v3067_v12  ;;  %v3415_v12 = vand.u32 4294901760, %v3109_v0  ;;  %v3421_v0 = vand.u32 4294901760, %v3153_v7 }
 0x20c   :  { %2432 = vmatprep.subr.bf16.mxu1 %v3116_v36 }
 0x20f   :  { %2434 = vmatpush3.bf16.msra.mxu1 %v3116_v36  ;;  %v3412_v36 = vand.u32 4294901760, %v3069_v15  ;;  %v3416_v15 = vand.u32 4294901760, %v3111_v33  ;;  %v3422_v33 = vand.u32 4294901760, %v3156_v8 }
 0x210   :  { %2436 = vmatprep.subr.bf16.mxu1 %v3130_v42 }
 0x213   :  { %2438 = vmatpush3.bf16.msra.mxu1 %v3130_v42  ;;  %v2523_v42 = vpack.c.bf16 %v3412_v36, %v3411_v31 }
 0x214   :  { %2440 = vmatprep.subr.bf16.mxu1 %v3158_v9 }
 0x217   :  { %2442 = vmatpush3.bf16.msra.mxu1 %v3158_v9  ;;  %v3413_v9 = vand.u32 4294901760, %v3093_v28  ;;  %v3418_v28 = vand.u32 4294901760, %v3126_v13  ;;  %v3425_v13 = vld [vmem:[#allocation14_spill] sm:$0xff] }
 0x218   :  { %2444 = vmatprep.subr.bf16.mxu1 %v3162_v62 }
 0x21b   :  { %2446 = vmatpush3.bf16.msra.mxu1 %v3162_v62  ;;  %v3414_v62 = vand.u32 4294901760, %v3095_v29 }
 0x21c   :  { %2448 = vmatprep.subr.bf16.mxu1 %v3182_v50 }
 0x21f   :  { %2450 = vmatpush3.bf16.msra.mxu1 %v3182_v50  ;;  %v2527_v50 = vpack.c.bf16 %v3414_v62, %v3413_v9 }
 0x220   :  { %2452 = vmatprep.subr.bf16.mxu1 %v3208_v19 }
 0x223   :  { %2454 = vmatpush3.bf16.msra.mxu1 %v3208_v19  ;;  %v2531_v19 = vpack.c.bf16 %v3416_v15, %v3415_v12 }
 0x224   :  { %2456 = vmatprep.subr.bf16.mxu1 %v3210_v3 }
 0x227   :  { %2458 = vmatpush3.bf16.msra.mxu1 %v3210_v3  ;;  %v3417_v3 = vand.u32 4294901760, %v3124_v10  ;;  %v3423_v10 = vld [vmem:[#allocation13_spill] sm:$0xff] }
 0x228   :  { %2460 = vmatprep.subr.bf16.mxu1 %v3214_v4 }
 0x229   :  { %v2535_v29 = vpack.c.bf16 %v3418_v28, %v3417_v3 }
 0x22a   :  { %2061 = vmatmul.mubr.f32.vlgmr.msra.gmra.mrb[0].mxu1 %v3247_v35 }
 0x22b   :  { %2462 = vmatpush3.bf16.msra.mxu1 %v3214_v4  ;;  %2095 = vmatprep.mubr.f32.mxu1 %v925_v24  ;;  %v3419_v4 = vand.u32 4294901760, %v3136_v55  ;;  %v3427_v55 = vld [vmem:[#allocation15_spill] sm:$0xff] }
 0x22c   :  { %2464 = vmatprep.subr.bf16.mxu1 %v3218_v6 }
 0x22f   :  { %2466 = vmatpush3.bf16.msra.mxu1 %v3218_v6  ;;  %v3420_v6 = vand.u32 4294901760, %v3139_v56  ;;  %v3429_v56 = vld [vmem:[#allocation16_spill] sm:$0xff] }
 0x230   :  { %2468 = vmatprep.subr.bf16.mxu1 %v3222_v49  ;;  %v3430_v22 = vand.u32 4294901760, %v3429_v56 }
 0x233   :  { %2470 = vmatpush3.bf16.msra.mxu1 %v3222_v49  ;;  %v2539_v49 = vpack.c.bf16 %v3420_v6, %v3419_v4 }
 0x234   :  { %2472 = vmatprep.subr.bf16.mxu1 %v3226_v54 }
 0x237   :  { %2474 = vmatpush3.bf16.msra.mxu1 %v3226_v54  ;;  %v2543_v54 = vpack.c.bf16 %v3422_v33, %v3421_v0 }
 0x238   :  { %2476 = vmatprep.subr.bf16.mxu1 %v3230_v32 }
 0x23b   :  { %2478 = vmatpush3.bf16.msra.mxu1 %v3230_v32  ;;  %v3424_v32 = vand.u32 4294901760, %v3423_v10 }
 0x23c   :  { %2480 = vmatprep.subr.bf16.mxu1 %v3234_v16 }
 0x23f   :  { %2482 = vmatpush3.bf16.msra.mxu1 %v3234_v16  ;;  %v3426_v16 = vand.u32 4294901760, %v3425_v13 }
 0x240   :  { %2484 = vmatprep.subr.bf16.mxu1 %v3238_v44 }
 0x243   :  { %2486 = vmatpush3.bf16.msra.mxu1 %v3238_v44  ;;  %v2547_v44 = vpack.c.bf16 %v3426_v16, %v3424_v32 }
 0x244   :  { %2488 = vmatprep.subr.bf16.mxu1 %v3242_v34 }
 0x247   :  { %2490 = vmatpush3.bf16.msra.mxu1 %v3242_v34  ;;  %v3428_v34 = vand.u32 4294901760, %v3427_v55 }
 0x248   :  { %2492 = vmatprep.subr.bf16.mxu1 %v3019_v23 }
 0x249   :  { %v2551_v57 = vpack.c.bf16 %v3430_v22, %v3428_v34 }
 0x24a   :  { %2096 = vmatmul.mubr.f32.vlgmr.msra.gmra.mrb[0].mxu1 %v3252_v63 }
 0x24b   :  { %2494 = vmatpush3.bf16.msra.mxu1 %v3019_v23  ;;  %2130 = vmatprep.mubr.f32.mxu1 %v926_v38 }
 0x24c   :  { %2496 = vmatprep.subr.bf16.mxu1 %v3023_v53 }
 0x24f   :  { %2498 = vmatpush3.bf16.msra.mxu1 %v3023_v53 }
 0x250   :  { %2500 = vmatprep.subr.bf16.mxu1 %v3027_v58 }
 0x253   :  { %2502 = vmatpush3.bf16.msra.mxu1 %v3027_v58 }
 0x254   :  { %2504 = vmatprep.subr.bf16.mxu1 %v3031_v5 }
 0x257   :  { %2506 = vmatpush3.bf16.msra.mxu1 %v3031_v5 }
 0x258   :  { %2508 = vmatprep.subr.bf16.mxu1 %v3041_v14 }
 0x25b   :  { %2510 = vmatpush3.bf16.msra.mxu1 %v3041_v14 }
 0x25c   :  { %2512 = vmatprep.subr.bf16.mxu1 %v3051_v45 }
 0x25f   :  { %2514 = vmatpush3.bf16.msra.mxu1 %v3051_v45 }
 0x260   :  { %2516 = vmatprep.subr.bf16.mxu1 %v3065_v11 }
 0x263   :  { %2518 = vmatpush3.bf16.msra.mxu1 %v3065_v11 }
 0x264   :  { %2520 = vmatprep.subr.bf16.mxu1 %v3085_v47 }
 0x267   :  { %2522 = vmatpush3.bf16.msra.mxu1 %v3085_v47 }
 0x268   :  { %2524 = vmatprep.subr.bf16.mxu1 %v2523_v42 }
 0x26a   :  { %2131 = vmatmul.mubr.f32.vlgmr.msra.gmra.mrb[0].mxu1 %v936_v37 }
 0x26b   :  { %2526 = vmatpush3.bf16.msra.mxu1 %v2523_v42  ;;  %2165 = vmatprep.mubr.f32.mxu1 %v3249_v51 }
 0x26c   :  { %2528 = vmatprep.subr.bf16.mxu1 %v2527_v50 }
 0x26f   :  { %2530 = vmatpush3.bf16.msra.mxu1 %v2527_v50 }
 0x270   :  { %2532 = vmatprep.subr.bf16.mxu1 %v2531_v19 }
 0x273   :  { %2534 = vmatpush3.bf16.msra.mxu1 %v2531_v19 }
 0x274   :  { %2536 = vmatprep.subr.bf16.mxu1 %v2535_v29 }
 0x277   :  { %2538 = vmatpush3.bf16.msra.mxu1 %v2535_v29 }
 0x278   :  { %2540 = vmatprep.subr.bf16.mxu1 %v2539_v49 }
 0x27b   :  { %2542 = vmatpush3.bf16.msra.mxu1 %v2539_v49 }
 0x27c   :  { %2544 = vmatprep.subr.bf16.mxu1 %v2543_v54 }
 0x27f   :  { %2546 = vmatpush3.bf16.msra.mxu1 %v2543_v54 }
 0x280   :  { %2548 = vmatprep.subr.bf16.mxu1 %v2547_v44 }
 0x283   :  { %2550 = vmatpush3.bf16.msra.mxu1 %v2547_v44 }
 0x284   :  { %2552 = vmatprep.subr.bf16.mxu1 %v2551_v57 }
 0x287   :  { %2554 = vmatpush3.bf16.msra.mxu1 %v2551_v57 }
 0x288   :  { %2556 = vmatprep.subr.bf16.mxu1 %v3019_v23 }
 0x28a   :  { %2166 = vmatmul.mubr.f32.vlgmr.msra.gmra.mrb[0].mxu1 %v3247_v35 }
 0x28b   :  { %2558 = vmatpush3.bf16.msra.mxu1 %v3019_v23  ;;  %2200 = vmatprep.mubr.f32.mxu1 %v3249_v51  ;;  %v1566_v23 = vld [vmem:[%s3385_s4] ss:$0 sm:$0xff] }
 0x28c   :  { %2560 = vmatprep.subr.bf16.mxu1 %v3023_v53 }
 0x28f   :  { %2562 = vmatpush3.bf16.msra.mxu1 %v3023_v53 }
 0x290   :  { %2564 = vmatprep.subr.bf16.mxu1 %v3027_v58 }
 0x293   :  { %2566 = vmatpush3.bf16.msra.mxu1 %v3027_v58 }
 0x294   :  { %2568 = vmatprep.subr.bf16.mxu1 %v3031_v5 }
 0x297   :  { %2570 = vmatpush3.bf16.msra.mxu1 %v3031_v5 }
 0x298   :  { %2572 = vmatprep.subr.bf16.mxu1 %v3041_v14 }
 0x29b   :  { %2574 = vmatpush3.bf16.msra.mxu1 %v3041_v14 }
 0x29c   :  { %2576 = vmatprep.subr.bf16.mxu1 %v3051_v45 }
 0x29f   :  { %2578 = vmatpush3.bf16.msra.mxu1 %v3051_v45 }
 0x2a0   :  { %2580 = vmatprep.subr.bf16.mxu1 %v3065_v11 }
 0x2a3   :  { %2582 = vmatpush3.bf16.msra.mxu1 %v3065_v11 }
 0x2a4   :  { %2584 = vmatprep.subr.bf16.mxu1 %v3085_v47 }
 0x2a7   :  { %2586 = vmatpush3.bf16.msra.mxu1 %v3085_v47 }
 0x2aa   :  { %2201 = vmatmul.mubr.f32.vlgmr.msra.gmra.mrb[0].mxu1 %v3247_v35 }
 0x37d   :  { %v2202_v53 = vpop.f32.mrb[0].mxu1 }
 0x37e   :  { %v1544_v58 = vadd.f32 %v2202_v53, %v1566_v23  ;;  %v1517_v5 = vpop.f32.mrb[1].mxu1 }
 0x37f   :  { %v1543_v14 = vadd.f32 %v1566_v23, %v1517_v5 }
 0x380   :  { %1546 = vst [vmem:[#allocation9 + $0x8] sm:$0xff] %v1544_v58 }
 0x381   :  { %1545 = vst [vmem:[#allocation9] sm:$0xff] %v1543_v14 }
 0x382   :  { %2700 = shalt.err (!%p2697_p0)
}
 0x383   :  { %s2701_s4 = scalar_lea.hbm %s3386_s5, 256 }
 0x384   :  { %p2702_p1 = scmp.ne.s32.totalorder %s3386_s5, %s2701_s4  ;;  %p2705_p2 = scmp.lt.u32.totalorder %s2701_s4, %s3386_s5 }
 0x386   :  { %p2707_p3 = pnand %p2705_p2, %p2702_p1 }
 0x388   :  { %2710 = shalt.err (!%p2707_p3)
}
 0x389   :  { %1558 = dma.vmem_to_hbm [thread:$0]  %s1553_s9, 256, %s3386_s5, [#allocation5], %s2719_s30, %s2719_s30, %s2720_s6  }
 0x38a   :  { %2715 = dma.done.wait [#allocation5], 256  }
 0x38b   :  { %2716 = vsyncadd [#allocation5], 4294967040 }
 0x38c   :  { %1562 = vsyncpa [#allocation4], 1 }
 0x38d   :  { %1563 = vsyncpa [#allocation7], 1 }
 0x38e   :  { %1564 = vsyncpa [#allocation5], 1 }

// kernel: tpu_custom_call.1
= control target key start
LH: loop header
LB: loop body
LE: loop exit
PB: predicated region body
PF: predicated region fallthrough
CT: control target
= control target key end

     0   :  { %10 = vsyncpa [#allocation4], 0  ;;  %s3381_s0 = inlined_call_operand.hbm [shape: f32[16,128], index: 0, kind: input, shape index: {}]   ;;  %s3382_s1 = inlined_call_operand.hbm [shape: f32[128,128], index: 1, kind: input, shape index: {}]   ;;  %s3383_s2 = inlined_call_operand.vmem [shape: f32[1,128], index: 2, kind: input, shape index: {}]   ;;  %s3384_s3 = inlined_call_operand.hbm [shape: f32[128,128], index: 3, kind: input, shape index: {}]   ;;  %s3385_s4 = inlined_call_operand.vmem [shape: f32[1,128], index: 4, kind: input, shape index: {}]   ;;  %s3386_s5 = inlined_call_operand.hbm [shape: f32[16,128], index: 5, kind: output, shape index: {}]  }
   0x1   :  { %11 = vsyncpa [#allocation7], 0 }
   0x2   :  { %12 = vsyncpa [#allocation5], 0  ;;  %s2717_s18 = smov [#allocation6]   ;;  %s2718_s20 = smov [#allocation3]  }
   0x3   :  { %s30_s19 = sshll.u32 %s2717_s18, 4  ;;  %s18_s21 = sshll.u32 %s2718_s20, 4  ;;  %s31_s19 = int_to_ptr.vmem [resolvable:$true] %s30_s19  ;;  %s2753_s21 = int_to_ptr.vmem [resolvable:$true] %s18_s21 }
   0x4   :  { %s2623_s24 = scalar_lea.hbm %s3382_s1, 2048 }
   0x5   :  { %p2624_p0 = scmp.ne.s32.totalorder %s3382_s1, %s2623_s24  ;;  %p2627_p1 = scmp.lt.u32.totalorder %s2623_s24, %s3382_s1 }
   0x7   :  { %p2629_p2 = pnand %p2627_p1, %p2624_p0 }
   0x9   :  { %2632 = shalt.err (!%p2629_p2)
}
   0xa   :  { %s2633_s29 = scalar_lea.vmem %s31_s19, 2048  ;;  %p2638_p4 = scmp.lt.s32.totalorder %s31_s19, %s31_s19 }
   0xb   :  { %p2634_p3 = scmp.ne.s32.totalorder %s31_s19, %s2633_s29  ;;  %p2639_p5 = scmp.lt.s32.totalorder %s2633_s29, %s2633_s29 }
   0xd   :  { %p2640_p6 = por %p2639_p5, %p2638_p4 }
   0xf   :  { %p2641_p7 = pnand %p2640_p6, %p2634_p3 }
  0x11   :  { %2644 = shalt.err (!%p2641_p7)
}
  0x12   :  { %s2719_s30 = smov 128   ;;  %s2720_s6 = smov 8  }
  0x13   :  { %36 = dma.hbm_to_vmem [thread:$0]  %s3382_s1, 2048, %s31_s19, [#allocation7], %s2719_s30, %s2719_s30, %s2720_s6  }
  0x14   :  { %s2645_s11 = scalar_lea.hbm %s3381_s0, 256 }
  0x15   :  { %p2646_p8 = scmp.ne.s32.totalorder %s3381_s0, %s2645_s11  ;;  %p2649_p9 = scmp.lt.u32.totalorder %s2645_s11, %s3381_s0 }
  0x17   :  { %p2651_p10 = pnand %p2649_p9, %p2646_p8 }
  0x19   :  { %2654 = shalt.err (!%p2651_p10)
}
  0x1a   :  { %s2655_s16 = scalar_lea.vmem %s2753_s21, 256  ;;  %p2660_p12 = scmp.lt.s32.totalorder %s2753_s21, %s2753_s21 }
  0x1b   :  { %p2656_p11 = scmp.ne.s32.totalorder %s2753_s21, %s2655_s16  ;;  %p2661_p13 = scmp.lt.s32.totalorder %s2655_s16, %s2655_s16 }
  0x1d   :  { %p2662_p0 = por %p2661_p13, %p2660_p12 }
  0x1f   :  { %p2663_p1 = pnand %p2662_p0, %p2656_p11 }
  0x21   :  { %2666 = shalt.err (!%p2663_p1)
}
  0x22   :  { %24 = dma.hbm_to_vmem [thread:$0]  %s3381_s0, 256, %s2753_s21, [#allocation4], %s2719_s30, %s2719_s30, %s2720_s6  }
  0x23   :  { %s2721_s18 = smov [#allocation8]   ;;  %s2667_s23 = scalar_lea.hbm %s3384_s3, 2048 }
  0x24   :  { %s44_s19 = sshll.u32 %s2721_s18, 4  ;;  %p2668_p2 = scmp.ne.s32.totalorder %s3384_s3, %s2667_s23  ;;  %s45_s19 = int_to_ptr.vmem [resolvable:$true] %s44_s19 }
  0x25   :  { %p2671_p3 = scmp.lt.u32.totalorder %s2667_s23, %s3384_s3 }
  0x27   :  { %p2673_p4 = pnand %p2671_p3, %p2668_p2 }
  0x29   :  { %2676 = shalt.err (!%p2673_p4)
}
  0x2a   :  { %s2677_s28 = scalar_lea.vmem %s45_s19, 2048  ;;  %p2682_p6 = scmp.lt.s32.totalorder %s45_s19, %s45_s19 }
  0x2b   :  { %p2678_p5 = scmp.ne.s32.totalorder %s45_s19, %s2677_s28  ;;  %p2683_p7 = scmp.lt.s32.totalorder %s2677_s28, %s2677_s28 }
  0x2d   :  { %p2684_p8 = por %p2683_p7, %p2682_p6 }
  0x2f   :  { %p2685_p9 = pnand %p2684_p8, %p2678_p5 }
  0x31   :  { %2688 = shalt.err (!%p2685_p9)
}
  0x32   :  { %50 = dma.hbm_to_vmem [thread:$0]  %s3384_s3, 2048, %s45_s19, [#allocation7], %s2719_s30, %s2719_s30, %s2720_s6  }
  0x33   :  { %2711 = dma.done.wait [#allocation4], 256  }
  0x34   :  { %2712 = vsyncadd [#allocation4], 4294967040 }
  0x35   :  { %2713 = dma.done.wait [#allocation7], 4096  }
  0x36   :  { %2714 = vsyncadd [#allocation7], 4294963200  ;;  %v70_v0 = vld [vmem:[#allocation6] sm:$0xff]  ;;  %v71_v1 = vld [vmem:[#allocation6 + $0x8] sm:$0xff]  ;;  %s2722_s8 = smov [#allocation9]  }
  0x37   :  { %v72_v2 = vld [vmem:[#allocation6 + $0x10] sm:$0xff]  ;;  %v94_v3 = vand.u32 4294901760, %v70_v0  ;;  %v97_v4 = vand.u32 4294901760, %v71_v1  ;;  %v73_v5 = vld [vmem:[#allocation6 + $0x18] sm:$0xff]  ;;  %v74_v7 = vld [vmem:[#allocation6 + $0x20] sm:$0xff]  ;;  %s1552_s9 = sshll.u32 %s2722_s8, 4  ;;  %s1553_s9 = int_to_ptr.vmem [resolvable:$true] %s1552_s9 }
  0x38   :  { %v100_v6 = vand.u32 4294901760, %v72_v2  ;;  %v75_v8 = vld [vmem:[#allocation6 + $0x28] sm:$0xff]  ;;  %v103_v9 = vand.u32 4294901760, %v73_v5  ;;  %v106_v11 = vand.u32 4294901760, %v74_v7  ;;  %v2809_v14 = vld [vmem:[#allocation6 + $0x30] sm:$0xff]  ;;  %v2811_v15 = vld [vmem:[#allocation6 + $0x38] sm:$0xff]  ;;  %p2694_p11 = scmp.lt.s32.totalorder %s1553_s9, %s1553_s9 }
  0x39   :  { %v2805_v10 = vpack.c.bf16 %v97_v4, %v94_v3  ;;  %v109_v12 = vand.u32 4294901760, %v75_v8  ;;  %v68_v16 = vld [vmem:[#allocation3] sm:$0xff]  ;;  %v112_v19 = vand.u32 4294901760, %v2809_v14  ;;  %v115_v20 = vand.u32 4294901760, %v2811_v15  ;;  %v78_v21 = vld [vmem:[#allocation6 + $0x40] sm:$0xff]  ;;  %v79_v22 = vld [vmem:[#allocation6 + $0x48] sm:$0xff] }
  0x3a   :  { %v2807_v13 = vpack.c.bf16 %v103_v9, %v100_v6  ;;  %v2815_v17 = vand.u32 4294901760, %v68_v16  ;;  %v2827_v25 = vsub.f32 %v70_v0, %v94_v3  ;;  %v118_v27 = vand.u32 4294901760, %v78_v21  ;;  %v69_v29 = vld [vmem:[#allocation3 + $0x8] sm:$0xff]  ;;  %v80_v30 = vld [vmem:[#allocation6 + $0x50] sm:$0xff]  ;;  %v82_v33 = vld [vmem:[#allocation6 + $0x60] sm:$0xff]  ;;  %s2689_s10 = scalar_lea.vmem %s1553_s9, 256 }
  0x3b   :  { %2204 = vmatprep.subr.bf16.mxu0 %v2805_v10  ;;  %v2818_v18 = vpack.c.bf16 %v109_v12, %v106_v11  ;;  %v2830_v26 = vpack.c.bf16 %v115_v20, %v112_v19  ;;  %v121_v28 = vand.u32 4294901760, %v79_v22  ;;  %v81_v31 = vld [vmem:[#allocation6 + $0x58] sm:$0xff]  ;;  %v83_v34 = vld [vmem:[#allocation6 + $0x68] sm:$0xff]  ;;  %v84_v35 = vld [vmem:[#allocation6 + $0x70] sm:$0xff]  ;;  %v2835_v36 = vsub.f32 %v71_v1, %v97_v4  ;;  %p2690_p10 = scmp.ne.s32.totalorder %s1553_s9, %s2689_s10  ;;  %p2695_p12 = scmp.lt.s32.totalorder %s2689_s10, %s2689_s10 }
  0x3c   :  { %2206 = vmatpush3.bf16.msra.mxu0 %v2805_v10  ;;  %v2823_v23 = vsub.f32 %v68_v16, %v2815_v17  ;;  %v85_v37 = vld [vmem:[#allocation6 + $0x78] sm:$0xff]  ;;  %v197_v39 = vand.u32 4294901760, %v2827_v25  ;;  %v2839_v40 = vand.u32 4294901760, %v69_v29  ;;  %v2841_v41 = vsub.f32 %v72_v2, %v100_v6 }
  0x3d   :  { %2208 = vmatprep.subr.bf16.mxu0 %v2807_v13  ;;  %v2844_v42 = vpack.c.bf16 %v121_v28, %v118_v27  ;;  %v124_v43 = vand.u32 4294901760, %v80_v30  ;;  %v127_v44 = vand.u32 4294901760, %v81_v31  ;;  %v130_v45 = vand.u32 4294901760, %v82_v33  ;;  %p2696_p13 = por %p2695_p12, %p2694_p11 }
  0x3e   :  { %v176_v24 = vand.u32 4294901760, %v2823_v23  ;;  %v133_v46 = vand.u32 4294901760, %v83_v34  ;;  %v136_v47 = vand.u32 4294901760, %v84_v35  ;;  %v139_v48 = vand.u32 4294901760, %v85_v37 }
  0x3f   :  { %v204_v49 = vand.u32 4294901760, %v2835_v36  ;;  %v2847_v50 = vsub.f32 %v73_v5, %v103_v9  ;;  %v2849_v51 = vsub.f32 %v74_v7, %v106_v11  ;;  %v198_v52 = vsub.f32 %v2827_v25, %v197_v39  ;;  %p2697_p0 = pnand %p2696_p13, %p2690_p10 }
  0x40   :  { %2210 = vmatpush3.bf16.msra.mxu0 %v2807_v13  ;;  %v177_v32 = vsub.f32 %v2823_v23, %v176_v24  ;;  %v2854_v53 = vsub.f32 %v69_v29, %v2839_v40  ;;  %v211_v54 = vand.u32 4294901760, %v2841_v41  ;;  %v2857_v55 = vsub.f32 %v75_v8, %v109_v12 }
  0x41   :  { %2212 = vmatprep.subr.bf16.mxu0 %v2818_v18  ;;  %v2860_v56 = vpack.c.bf16 %v127_v44, %v124_v43  ;;  %v2862_v57 = vpack.c.bf16 %v133_v46, %v130_v45  ;;  %v2864_v58 = vpack.c.bf16 %v139_v48, %v136_v47  ;;  %v205_v59 = vsub.f32 %v2835_v36, %v204_v49 }
  0x42   :  { %v178_v38 = vand.u32 4294901760, %v177_v32  ;;  %v218_v60 = vand.u32 4294901760, %v2847_v50  ;;  %v225_v61 = vand.u32 4294901760, %v2849_v51  ;;  %v199_v62 = vand.u32 4294901760, %v198_v52 }
  0x43   :  { %v186_v63 = vand.u32 4294901760, %v2854_v53  ;;  %v212_v0 = vsub.f32 %v2841_v41, %v211_v54  ;;  %v232_v1 = vand.u32 4294901760, %v2857_v55  ;;  %v2875_v2 = vsub.f32 %v2809_v14, %v112_v19 }
  0x44   :  { %2214 = vmatpush3.bf16.msra.mxu0 %v2818_v18  ;;  %1815 = vmatprep.mubr.f32.mxu0 %v178_v38  ;;  %v2878_v3 = vsub.f32 %v2811_v15, %v115_v20  ;;  %v2880_v4 = vsub.f32 %v78_v21, %v118_v27  ;;  %v2882_v5 = vsub.f32 %v79_v22, %v121_v28  ;;  %v206_v11 = vand.u32 4294901760, %v205_v59 }
  0x45   :  { %2216 = vmatprep.subr.bf16.mxu0 %v2830_v26  ;;  %v2884_v6 = vsub.f32 %v80_v30, %v124_v43  ;;  %v2886_v7 = vsub.f32 %v81_v31, %v127_v44  ;;  %v2888_v8 = vsub.f32 %v82_v33, %v130_v45  ;;  %v2890_v9 = vsub.f32 %v83_v34, %v133_v46 }
  0x46   :  { %v219_v12 = vsub.f32 %v2847_v50, %v218_v60  ;;  %v2893_v14 = vsub.f32 %v84_v35, %v136_v47  ;;  %v2895_v16 = vsub.f32 %v85_v37, %v139_v48  ;;  %v187_v15 = vsub.f32 %v2854_v53, %v186_v63 }
  0x47   :  { %v213_v19 = vand.u32 4294901760, %v212_v0  ;;  %v226_v20 = vsub.f32 %v2849_v51, %v225_v61  ;;  %v233_v21 = vsub.f32 %v2857_v55, %v232_v1  ;;  %v239_v22 = vand.u32 4294901760, %v2875_v2 }
  0x48   :  { %2218 = vmatpush3.bf16.msra.mxu0 %v2830_v26  ;;  %v246_v27 = vand.u32 4294901760, %v2878_v3  ;;  %v253_v28 = vand.u32 4294901760, %v2880_v4  ;;  %v260_v29 = vand.u32 4294901760, %v2882_v5  ;;  %v267_v30 = vand.u32 4294901760, %v2884_v6 }
  0x49   :  { %2220 = vmatprep.subr.bf16.mxu0 %v2844_v42  ;;  %v274_v31 = vand.u32 4294901760, %v2886_v7  ;;  %v281_v32 = vand.u32 4294901760, %v2888_v8  ;;  %v288_v33 = vand.u32 4294901760, %v2890_v9  ;;  %v295_v34 = vand.u32 4294901760, %v2893_v14 }
  0x4a   :  { %v302_v35 = vand.u32 4294901760, %v2895_v16  ;;  %v2914_v37 = vpack.c.bf16 %v204_v49, %v197_v39  ;;  %v2916_v38 = vpack.c.bf16 %v218_v60, %v211_v54  ;;  %v2235_v43 = vpack.c.bf16 %v206_v11, %v199_v62 }
  0x4b   :  { %v2919_v44 = vpack.c.bf16 %v232_v1, %v225_v61  ;;  %v2921_v45 = vpack.c.bf16 %v246_v27, %v239_v22  ;;  %v2923_v46 = vpack.c.bf16 %v260_v29, %v253_v28  ;;  %v220_v47 = vand.u32 4294901760, %v219_v12 }
  0x4c   :  { %2222 = vmatpush3.bf16.msra.mxu0 %v2844_v42  ;;  %v2926_v48 = vpack.c.bf16 %v274_v31, %v267_v30  ;;  %v2928_v52 = vpack.c.bf16 %v288_v33, %v281_v32  ;;  %v2930_v39 = vpack.c.bf16 %v302_v35, %v295_v34  ;;  %v188_v49 = vand.u32 4294901760, %v187_v15 }
  0x4d   :  { %2224 = vmatprep.subr.bf16.mxu0 %v2860_v56  ;;  %v227_v54 = vand.u32 4294901760, %v226_v20  ;;  %v234_v59 = vand.u32 4294901760, %v233_v21  ;;  %v2239_v60 = vpack.c.bf16 %v220_v47, %v213_v19  ;;  %v240_v61 = vsub.f32 %v2875_v2, %v239_v22 }
  0x4e   :  { %v247_v62 = vsub.f32 %v2878_v3, %v246_v27  ;;  %v254_v12 = vsub.f32 %v2880_v4, %v253_v28  ;;  %v261_v15 = vsub.f32 %v2882_v5, %v260_v29  ;;  %v268_v20 = vsub.f32 %v2884_v6, %v267_v30 }
  0x4f   :  { %v2243_v0 = vpack.c.bf16 %v234_v59, %v227_v54  ;;  %v241_v1 = vand.u32 4294901760, %v240_v61  ;;  %v275_v27 = vsub.f32 %v2886_v7, %v274_v31  ;;  %v289_v28 = vsub.f32 %v2890_v9, %v288_v33 }
  0x50   :  { %2226 = vmatpush3.bf16.msra.mxu0 %v2860_v56  ;;  %v248_v11 = vand.u32 4294901760, %v247_v62  ;;  %v255_v21 = vand.u32 4294901760, %v254_v12  ;;  %v262_v22 = vand.u32 4294901760, %v261_v15  ;;  %v303_v61 = vsub.f32 %v2895_v16, %v302_v35 }
  0x51   :  { %2228 = vmatprep.subr.bf16.mxu0 %v2862_v57  ;;  %v276_v54 = vand.u32 4294901760, %v275_v27  ;;  %v290_v30 = vand.u32 4294901760, %v289_v28  ;;  %v2267_v33 = vpack.c.bf16 %v2835_v36, %v2827_v25  ;;  %v2275_v35 = vpack.c.bf16 %v2857_v55, %v2849_v51  ;;  %v831_v55 = vld [vmem:[#allocation8 + $0x20] sm:$0xff] }
  0x52   :  { %v2247_v19 = vpack.c.bf16 %v248_v11, %v241_v1  ;;  %v2251_v47 = vpack.c.bf16 %v262_v22, %v255_v21  ;;  %v2279_v1 = vpack.c.bf16 %v2878_v3, %v2875_v2  ;;  %v2283_v25 = vpack.c.bf16 %v2882_v5, %v2880_v4  ;;  %v834_v2 = vld [vmem:[#allocation8 + $0x38] sm:$0xff] }
  0x53   :  { %v2287_v36 = vpack.c.bf16 %v2886_v7, %v2884_v6  ;;  %v865_v4 = vand.u32 4294901760, %v834_v2  ;;  %v3033_v6 = vld [vmem:[#allocation8 + $0x40] sm:$0xff]  ;;  %v3035_v7 = vld [vmem:[#allocation8 + $0x48] sm:$0xff] }
  0x54   :  { %2230 = vmatpush3.bf16.msra.mxu0 %v2862_v57 }
  0x55   :  { %2232 = vmatprep.subr.bf16.mxu0 %v2864_v58 }
  0x58   :  { %2234 = vmatpush3.bf16.msra.mxu0 %v2864_v58 }
  0x59   :  { %2236 = vmatprep.subr.bf16.mxu0 %v2235_v43 }
  0x5b   :  { %1816 = vmatmul.mubr.f32.vlgmr.msra.gmra.mrb[0].mxu0 %v188_v49  ;;  %v269_v49 = vand.u32 4294901760, %v268_v20  ;;  %v3071_v20 = vld [vmem:[#allocation8 + $0x70] sm:$0xff] }
  0x5c   :  { %2238 = vmatpush3.bf16.msra.mxu0 %v2235_v43  ;;  %1850 = vmatprep.mubr.f32.mxu0 %v2815_v17  ;;  %v282_v43 = vsub.f32 %v2888_v8, %v281_v32  ;;  %v304_v32 = vand.u32 4294901760, %v303_v61  ;;  %v886_v21 = vand.u32 4294901760, %v3071_v20 }
  0x5d   :  { %2240 = vmatprep.subr.bf16.mxu0 %v2239_v60  ;;  %v2255_v59 = vpack.c.bf16 %v276_v54, %v269_v49 }
  0x5e   :  { %v283_v29 = vand.u32 4294901760, %v282_v43 }
  0x60   :  { %2242 = vmatpush3.bf16.msra.mxu0 %v2239_v60  ;;  %v296_v60 = vsub.f32 %v2893_v14, %v295_v34  ;;  %v2259_v31 = vpack.c.bf16 %v290_v30, %v283_v29  ;;  %v2271_v34 = vpack.c.bf16 %v2847_v50, %v2841_v41  ;;  %v2291_v41 = vpack.c.bf16 %v2890_v9, %v2888_v8 }
  0x61   :  { %2244 = vmatprep.subr.bf16.mxu0 %v2243_v0  ;;  %v2295_v50 = vpack.c.bf16 %v2895_v16, %v2893_v14  ;;  %v868_v8 = vand.u32 4294901760, %v3033_v6  ;;  %v871_v9 = vand.u32 4294901760, %v3035_v7  ;;  %v3043_v16 = vld [vmem:[#allocation8 + $0x50] sm:$0xff] }
  0x62   :  { %v297_v62 = vand.u32 4294901760, %v296_v60 }
  0x63   :  { %v3041_v14 = vpack.c.bf16 %v871_v9, %v868_v8 }
  0x64   :  { %2246 = vmatpush3.bf16.msra.mxu0 %v2243_v0  ;;  %v2263_v0 = vpack.c.bf16 %v304_v32, %v297_v62 }
  0x65   :  { %2248 = vmatprep.subr.bf16.mxu0 %v2247_v19 }
  0x68   :  { %2250 = vmatpush3.bf16.msra.mxu0 %v2247_v19  ;;  %v3073_v19 = vld [vmem:[#allocation8 + $0x78] sm:$0xff] }
  0x69   :  { %2252 = vmatprep.subr.bf16.mxu0 %v2251_v47  ;;  %v889_v22 = vand.u32 4294901760, %v3073_v19 }
  0x6c   :  { %2254 = vmatpush3.bf16.msra.mxu0 %v2251_v47  ;;  %v3085_v47 = vpack.c.bf16 %v889_v22, %v886_v21 }
  0x6d   :  { %2256 = vmatprep.subr.bf16.mxu0 %v2255_v59 }
  0x70   :  { %2258 = vmatpush3.bf16.msra.mxu0 %v2255_v59 }
  0x71   :  { %2260 = vmatprep.subr.bf16.mxu0 %v2259_v31 }
  0x74   :  { %2262 = vmatpush3.bf16.msra.mxu0 %v2259_v31 }
  0x75   :  { %2264 = vmatprep.subr.bf16.mxu0 %v2263_v0 }
  0x78   :  { %2266 = vmatpush3.bf16.msra.mxu0 %v2263_v0 }
  0x79   :  { %2268 = vmatprep.subr.bf16.mxu0 %v2267_v33 }
  0x7b   :  { %1851 = vmatmul.mubr.f32.vlgmr.msra.gmra.mrb[0].mxu0 %v2839_v40 }
  0x7c   :  { %2270 = vmatpush3.bf16.msra.mxu0 %v2267_v33  ;;  %1885 = vmatprep.mubr.f32.mxu0 %v2823_v23 }
  0x7d   :  { %2272 = vmatprep.subr.bf16.mxu0 %v2271_v34 }
  0x80   :  { %2274 = vmatpush3.bf16.msra.mxu0 %v2271_v34 }
  0x81   :  { %2276 = vmatprep.subr.bf16.mxu0 %v2275_v35 }
  0x84   :  { %2278 = vmatpush3.bf16.msra.mxu0 %v2275_v35 }
  0x85   :  { %2280 = vmatprep.subr.bf16.mxu0 %v2279_v1 }
  0x88   :  { %2282 = vmatpush3.bf16.msra.mxu0 %v2279_v1 }
  0x89   :  { %2284 = vmatprep.subr.bf16.mxu0 %v2283_v25 }
  0x8c   :  { %2286 = vmatpush3.bf16.msra.mxu0 %v2283_v25 }
  0x8d   :  { %2288 = vmatprep.subr.bf16.mxu0 %v2287_v36 }
  0x90   :  { %2290 = vmatpush3.bf16.msra.mxu0 %v2287_v36 }
  0x91   :  { %2292 = vmatprep.subr.bf16.mxu0 %v2291_v41 }
  0x94   :  { %2294 = vmatpush3.bf16.msra.mxu0 %v2291_v41 }
  0x95   :  { %2296 = vmatprep.subr.bf16.mxu0 %v2295_v50 }
  0x98   :  { %2298 = vmatpush3.bf16.msra.mxu0 %v2295_v50 }
  0x99   :  { %2300 = vmatprep.subr.bf16.mxu0 %v2805_v10 }
  0x9b   :  { %1886 = vmatmul.mubr.f32.vlgmr.msra.gmra.mrb[0].mxu0 %v2854_v53 }
  0x9c   :  { %2302 = vmatpush3.bf16.msra.mxu0 %v2805_v10  ;;  %1920 = vmatprep.mubr.f32.mxu0 %v176_v24  ;;  %v829_v24 = vld [vmem:[#allocation8 + $0x10] sm:$0xff] }
  0x9d   :  { %2304 = vmatprep.subr.bf16.mxu0 %v2807_v13 }
  0xa0   :  { %2306 = vmatpush3.bf16.msra.mxu0 %v2807_v13 }
  0xa1   :  { %2308 = vmatprep.subr.bf16.mxu0 %v2818_v18 }
  0xa4   :  { %2310 = vmatpush3.bf16.msra.mxu0 %v2818_v18 }
  0xa5   :  { %2312 = vmatprep.subr.bf16.mxu0 %v2830_v26 }
  0xa8   :  { %2314 = vmatpush3.bf16.msra.mxu0 %v2830_v26 }
  0xa9   :  { %2316 = vmatprep.subr.bf16.mxu0 %v2844_v42 }
  0xac   :  { %2318 = vmatpush3.bf16.msra.mxu0 %v2844_v42 }
  0xad   :  { %2320 = vmatprep.subr.bf16.mxu0 %v2860_v56 }
  0xb0   :  { %2322 = vmatpush3.bf16.msra.mxu0 %v2860_v56 }
  0xb1   :  { %2324 = vmatprep.subr.bf16.mxu0 %v2862_v57 }
  0xb4   :  { %2326 = vmatpush3.bf16.msra.mxu0 %v2862_v57 }
  0xb5   :  { %2328 = vmatprep.subr.bf16.mxu0 %v2864_v58 }
  0xb8   :  { %2330 = vmatpush3.bf16.msra.mxu0 %v2864_v58 }
  0xb9   :  { %2332 = vmatprep.subr.bf16.mxu0 %v2914_v37 }
  0xbb   :  { %1921 = vmatmul.mubr.f32.vlgmr.msra.gmra.mrb[0].mxu0 %v186_v63  ;;  %v833_v63 = vld [vmem:[#allocation8 + $0x30] sm:$0xff] }
  0xbc   :  { %2334 = vmatpush3.bf16.msra.mxu0 %v2914_v37  ;;  %1955 = vmatprep.mubr.f32.mxu0 %v2815_v17  ;;  %v862_v3 = vand.u32 4294901760, %v833_v63  ;;  %v3045_v37 = vld [vmem:[#allocation8 + $0x58] sm:$0xff] }
  0xbd   :  { %2336 = vmatprep.subr.bf16.mxu0 %v2916_v38 }
  0xbe   :  { %v3031_v5 = vpack.c.bf16 %v865_v4, %v862_v3 }
  0xc0   :  { %2338 = vmatpush3.bf16.msra.mxu0 %v2916_v38  ;;  %v874_v38 = vand.u32 4294901760, %v3043_v16 }
  0xc1   :  { %2340 = vmatprep.subr.bf16.mxu0 %v2919_v44 }
  0xc4   :  { %2342 = vmatpush3.bf16.msra.mxu0 %v2919_v44  ;;  %v877_v44 = vand.u32 4294901760, %v3045_v37 }
  0xc5   :  { %2344 = vmatprep.subr.bf16.mxu0 %v2921_v45 }
  0xc8   :  { %2346 = vmatpush3.bf16.msra.mxu0 %v2921_v45  ;;  %v3051_v45 = vpack.c.bf16 %v877_v44, %v874_v38 }
  0xc9   :  { %2348 = vmatprep.subr.bf16.mxu0 %v2923_v46 }
  0xcc   :  { %2350 = vmatpush3.bf16.msra.mxu0 %v2923_v46  ;;  %v3053_v46 = vld [vmem:[#allocation8 + $0x60] sm:$0xff] }
  0xcd   :  { %2352 = vmatprep.subr.bf16.mxu0 %v2926_v48 }
  0xd0   :  { %2354 = vmatpush3.bf16.msra.mxu0 %v2926_v48  ;;  %v3055_v48 = vld [vmem:[#allocation8 + $0x68] sm:$0xff] }
  0xd1   :  { %2356 = vmatprep.subr.bf16.mxu0 %v2928_v52 }
  0xd4   :  { %2358 = vmatpush3.bf16.msra.mxu0 %v2928_v52  ;;  %v880_v52 = vand.u32 4294901760, %v3053_v46 }
  0xd5   :  { %2360 = vmatprep.subr.bf16.mxu0 %v2930_v39 }
  0xd8   :  { %2362 = vmatpush3.bf16.msra.mxu0 %v2930_v39  ;;  %v883_v39 = vand.u32 4294901760, %v3055_v48 }
  0xd9   :  { %2364 = vmatprep.subr.bf16.mxu0 %v2805_v10 }
  0xda   :  { %v3065_v11 = vpack.c.bf16 %v883_v39, %v880_v52 }
  0xdb   :  { %1956 = vmatmul.mubr.f32.vlgmr.msra.gmra.mrb[0].mxu0 %v2839_v40 }
  0xdc   :  { %2366 = vmatpush3.bf16.msra.mxu0 %v2805_v10  ;;  %1990 = vmatprep.mubr.f32.mxu0 %v2815_v17  ;;  %v827_v10 = vld [vmem:[#allocation8] sm:$0xff] }
  0xdd   :  { %2368 = vmatprep.subr.bf16.mxu0 %v2807_v13  ;;  %v844_v17 = vand.u32 4294901760, %v827_v10 }
  0xdf   :  { %v3067_v12 = vsub.f32 %v827_v10, %v844_v17  ;;  %v3124_v10 = vsub.f32 %v833_v63, %v862_v3 }
  0xe0   :  { %2370 = vmatpush3.bf16.msra.mxu0 %v2807_v13  ;;  %v828_v13 = vld [vmem:[#allocation8 + $0x8] sm:$0xff] }
  0xe1   :  { %2372 = vmatprep.subr.bf16.mxu0 %v2818_v18  ;;  %v3402_v27 = vand.u32 4294901760, %v3067_v12 }
  0xe3   :  { %v948_v49 = vsub.f32 %v3067_v12, %v3402_v27 }
  0xe4   :  { %2374 = vmatpush3.bf16.msra.mxu0 %v2818_v18  ;;  %v847_v18 = vand.u32 4294901760, %v828_v13 }
  0xe5   :  { %2376 = vmatprep.subr.bf16.mxu0 %v2830_v26  ;;  %v949_v59 = vand.u32 4294901760, %v948_v49 }
  0xe6   :  { %v3019_v23 = vpack.c.bf16 %v847_v18, %v844_v17  ;;  %v3069_v15 = vsub.f32 %v828_v13, %v847_v18  ;;  %v3126_v13 = vsub.f32 %v834_v2, %v865_v4 }
  0xe8   :  { %2378 = vmatpush3.bf16.msra.mxu0 %v2830_v26  ;;  %v830_v26 = vld [vmem:[#allocation8 + $0x18] sm:$0xff]  ;;  %2396 = vmatprep.subr.bf16.mxu1 %v3019_v23  ;;  %v3401_v43 = vand.u32 4294901760, %v3069_v15 }
  0xe9   :  { %2380 = vmatprep.subr.bf16.mxu0 %v2844_v42  ;;  %v853_v51 = vand.u32 4294901760, %v830_v26  ;;  %2398 = vmatpush3.bf16.msra.mxu1 %v3019_v23 }
  0xea   :  { %v955_v54 = vsub.f32 %v3069_v15, %v3401_v43 }
  0xeb   :  { %v3095_v29 = vsub.f32 %v830_v26, %v853_v51  ;;  %v3395_v26 = vand.u32 4294901760, %v3126_v13 }
  0xec   :  { %2382 = vmatpush3.bf16.msra.mxu0 %v2844_v42  ;;  %v850_v42 = vand.u32 4294901760, %v829_v24  ;;  %v956_v30 = vand.u32 4294901760, %v955_v54 }
  0xed   :  { %2384 = vmatprep.subr.bf16.mxu0 %v2860_v56  ;;  %v3399_v61 = vand.u32 4294901760, %v3095_v29 }
  0xee   :  { %v3023_v53 = vpack.c.bf16 %v853_v51, %v850_v42  ;;  %v3093_v28 = vsub.f32 %v829_v24, %v850_v42  ;;  %v3101_v31 = vpack.c.bf16 %v956_v30, %v949_v59  ;;  %v3396_v24 = vand.u32 4294901760, %v3124_v10 }
  0xef   :  { %v969_v32 = vsub.f32 %v3095_v29, %v3399_v61 }
  0xf0   :  { %2386 = vmatpush3.bf16.msra.mxu0 %v2860_v56  ;;  %v832_v56 = vld [vmem:[#allocation8 + $0x28] sm:$0xff]  ;;  %2400 = vmatprep.subr.bf16.mxu1 %v3023_v53  ;;  %v3400_v60 = vand.u32 4294901760, %v3093_v28  ;;  %v990_v51 = vsub.f32 %v3124_v10, %v3396_v24 }
  0xf1   :  { %2388 = vmatprep.subr.bf16.mxu0 %v2862_v57  ;;  %2402 = vmatpush3.bf16.msra.mxu1 %v3023_v53  ;;  %v970_v35 = vand.u32 4294901760, %v969_v32 }
  0xf2   :  { %v962_v62 = vsub.f32 %v3093_v28, %v3400_v60 }
  0xf4   :  { %2390 = vmatpush3.bf16.msra.mxu0 %v2862_v57  ;;  %v859_v57 = vand.u32 4294901760, %v832_v56  ;;  %v963_v34 = vand.u32 4294901760, %v962_v62 }
  0xf5   :  { %2392 = vmatprep.subr.bf16.mxu0 %v2864_v58 }
  0xf6   :  { %v3111_v33 = vsub.f32 %v832_v56, %v859_v57  ;;  %v3116_v36 = vpack.c.bf16 %v970_v35, %v963_v34  ;;  %v3139_v56 = vsub.f32 %v3035_v7, %v871_v9  ;;  %v3153_v7 = vsub.f32 %v3043_v16, %v874_v38 }
  0xf7   :  { %v3178_v38 = vsub.f32 %v3055_v48, %v883_v39  ;;  %v3195_v48 = vsub.f32 %v3073_v19, %v889_v22 }
  0xf8   :  { %2394 = vmatpush3.bf16.msra.mxu0 %v2864_v58  ;;  %v3397_v25 = vand.u32 4294901760, %v3111_v33  ;;  %v3393_v2 = vand.u32 4294901760, %v3139_v56  ;;  %v3392_v59 = vand.u32 4294901760, %v3153_v7 }
  0xf9   :  { %3408 = vst [vmem:[#allocation14_spill] sm:$0xff] %v3178_v38  ;;  %3410 = vst [vmem:[#allocation16_spill] sm:$0xff] %v3195_v48 }
  0xfa   :  { %v983_v50 = vsub.f32 %v3111_v33, %v3397_v25  ;;  %v1018_v32 = vsub.f32 %v3153_v7, %v3392_v59 }
  0xfb   :  { %1991 = vmatmul.mubr.f32.vlgmr.msra.gmra.mrb[0].mxu0 %v2839_v40  ;;  %v856_v40 = vand.u32 4294901760, %v831_v55 }
  0xfc   :  { %v984_v18 = vand.u32 4294901760, %v983_v50 }
  0xfd   :  { %v3027_v58 = vpack.c.bf16 %v859_v57, %v856_v40  ;;  %v3109_v0 = vsub.f32 %v831_v55, %v856_v40  ;;  %v3136_v55 = vsub.f32 %v3033_v6, %v868_v8  ;;  %v997_v40 = vsub.f32 %v3126_v13, %v3395_v26 }
  0xfe   :  { %v991_v57 = vand.u32 4294901760, %v990_v51  ;;  %v1011_v6 = vsub.f32 %v3139_v56, %v3393_v2  ;;  %v3156_v8 = vsub.f32 %v3045_v37, %v877_v44  ;;  %v3173_v37 = vsub.f32 %v3053_v46, %v880_v52 }
  0xff   :  { %2404 = vmatprep.subr.bf16.mxu1 %v3027_v58  ;;  %v3398_v1 = vand.u32 4294901760, %v3109_v0  ;;  %v3394_v63 = vand.u32 4294901760, %v3136_v55  ;;  %v998_v3 = vand.u32 4294901760, %v997_v40  ;;  %v1019_v44 = vand.u32 4294901760, %v1018_v32 }
 0x100   :  { %2406 = vmatpush3.bf16.msra.mxu1 %v3027_v58  ;;  %v1012_v54 = vand.u32 4294901760, %v1011_v6  ;;  %v3391_v30 = vand.u32 4294901760, %v3156_v8  ;;  %3407 = vst [vmem:[#allocation13_spill] sm:$0xff] %v3173_v37  ;;  %v3390_v35 = vand.u32 4294901760, %v3173_v37  ;;  %v3190_v46 = vsub.f32 %v3071_v20, %v886_v21 }
 0x101   :  { %2408 = vmatprep.subr.bf16.mxu1 %v3031_v5  ;;  %v976_v41 = vsub.f32 %v3109_v0, %v3398_v1  ;;  %v1004_v4 = vsub.f32 %v3136_v55, %v3394_v63  ;;  %v3158_v9 = vpack.c.bf16 %v998_v3, %v991_v57  ;;  %v3387_v51 = vand.u32 4294901760, %v3195_v48 }
 0x102   :  { %v1025_v16 = vsub.f32 %v3156_v8, %v3391_v30  ;;  %3409 = vst [vmem:[#allocation15_spill] sm:$0xff] %v3190_v46  ;;  %v3218_v6 = vpack.c.bf16 %v3095_v29, %v3093_v28  ;;  %v3230_v32 = vpack.c.bf16 %v3139_v56, %v3136_v55 }
 0x103   :  { %v977_v17 = vand.u32 4294901760, %v976_v41  ;;  %v1005_v49 = vand.u32 4294901760, %v1004_v4  ;;  %v3389_v41 = vand.u32 4294901760, %v3178_v38  ;;  %v1053_v21 = vsub.f32 %v3195_v48, %v3387_v51 }
 0x104   :  { %2410 = vmatpush3.bf16.msra.mxu1 %v3031_v5  ;;  %v1026_v34 = vand.u32 4294901760, %v1025_v16  ;;  %v3214_v4 = vpack.c.bf16 %v3069_v15, %v3067_v12  ;;  %v3234_v16 = vpack.c.bf16 %v3156_v8, %v3153_v7 }
 0x105   :  { %2412 = vmatprep.subr.bf16.mxu1 %v3041_v14  ;;  %v3130_v42 = vpack.c.bf16 %v984_v18, %v977_v17  ;;  %v3162_v62 = vpack.c.bf16 %v1012_v54, %v1005_v49  ;;  %v1032_v17 = vsub.f32 %v3173_v37, %v3390_v35  ;;  %v1039_v52 = vsub.f32 %v3178_v38, %v3389_v41 }
 0x106   :  { %v3182_v50 = vpack.c.bf16 %v1026_v34, %v1019_v44  ;;  %v3388_v18 = vand.u32 4294901760, %v3190_v46  ;;  %v1054_v57 = vand.u32 4294901760, %v1053_v21  ;;  %v3222_v49 = vpack.c.bf16 %v3111_v33, %v3109_v0 }
 0x107   :  { %v1033_v39 = vand.u32 4294901760, %v1032_v17  ;;  %v1040_v40 = vand.u32 4294901760, %v1039_v52  ;;  %v3226_v54 = vpack.c.bf16 %v3126_v13, %v3124_v10  ;;  %v3238_v44 = vpack.c.bf16 %v3178_v38, %v3173_v37  ;;  %v1565_v17 = vld [vmem:[%s3383_s2] ss:$0 sm:$0xff] }
 0x108   :  { %2414 = vmatpush3.bf16.msra.mxu1 %v3041_v14  ;;  %v1046_v20 = vsub.f32 %v3190_v46, %v3388_v18  ;;  %v3242_v34 = vpack.c.bf16 %v3195_v48, %v3190_v46 }
 0x109   :  { %2416 = vmatprep.subr.bf16.mxu1 %v3051_v45  ;;  %v3208_v19 = vpack.c.bf16 %v1040_v40, %v1033_v39 }
 0x10a   :  { %v1047_v22 = vand.u32 4294901760, %v1046_v20 }
 0x10c   :  { %2418 = vmatpush3.bf16.msra.mxu1 %v3051_v45  ;;  %v3210_v3 = vpack.c.bf16 %v1054_v57, %v1047_v22 }
 0x10d   :  { %2420 = vmatprep.subr.bf16.mxu1 %v3065_v11 }
 0x110   :  { %2422 = vmatpush3.bf16.msra.mxu1 %v3065_v11 }
 0x111   :  { %2424 = vmatprep.subr.bf16.mxu1 %v3085_v47 }
 0x114   :  { %2426 = vmatpush3.bf16.msra.mxu1 %v3085_v47 }
 0x115   :  { %2428 = vmatprep.subr.bf16.mxu1 %v3101_v31 }
 0x1ce   :  { %v1992_v52 = vpop.f32.mrb[0].mxu0 }
 0x1cf   :  { %v2587_v39 = vadd.f32 %v1992_v52, %v1565_v17  ;;  %v767_v40 = vpop.f32.mrb[1].mxu0 }
 0x1d0   :  { %v2588_v20 = vadd.f32 %v1565_v17, %v767_v40 }
 0x1d1   :  { %v778_v21 = vand.u32 2147483647, %v2587_v39 }
 0x1d2   :  { %v777_v22 = vand.u32 2147483647, %v2588_v20 }
 0x1d3   :  { %v780_v57 = vmul.f32 0.70710677, %v778_v21 }
 0x1d4   :  { %v779_v51 = vmul.f32 0.70710677, %v777_v22 }
 0x1d5   :  { %v782_v18 = vmul.f32 0.3275911, %v780_v57  ;;  %v806_v59 = vmul.f32 %v780_v57, %v780_v57 }
 0x1d6   :  { %v781_v41 = vmul.f32 0.3275911, %v779_v51  ;;  %v805_v2 = vmul.f32 %v779_v51, %v779_v51 }
 0x1d7   :  { %v784_v35 = vadd.f32 1.0, %v782_v18  ;;  %v808_v26 = vsub.f32 0.0, %v806_v59 }
 0x1d8   :  { %v783_v30 = vadd.f32 1.0, %v781_v41  ;;  %v807_v1 = vsub.f32 0.0, %v805_v2 }
 0x1d9   :  { %2615 = vrcp.f32 %v784_v35  ;;  %v811_v17 = vmul.f32 1.442695, %v808_v26 }
 0x1da   :  { %2617 = vrcp.f32 %v783_v30  ;;  %v809_v43 = vmul.f32 1.442695, %v807_v1 }
 0x1db   :  { %2619 = vpow2.f32 %v811_v17  ;;  %v819_v17 = vmul.f32 0.5, %v777_v22 }
 0x1dc   :  { %2621 = vpow2.f32 %v809_v43  ;;  %v817_v43 = vmul.f32 0.5, %v2588_v20 }
 0x1e3   :  { %v2616_v63 = vpop.eup %2615 }
 0x1e4   :  { %v2618_v24 = vpop.eup %2617  ;;  %v788_v25 = vmul.f32 1.0614054, %v2616_v63 }
 0x1e5   :  { %v787_v52 = vmul.f32 1.0614054, %v2618_v24  ;;  %v2620_v37 = vpop.eup %2619 }
 0x1e6   :  { %v790_v61 = vadd.f32 -1.4531521, %v788_v25  ;;  %v2622_v26 = vpop.eup %2621 }
 0x1e7   :  { %v789_v40 = vadd.f32 -1.4531521, %v787_v52 }
 0x1e8   :  { %v792_v60 = vmul.f32 %v2616_v63, %v790_v61 }
 0x1e9   :  { %v791_v27 = vmul.f32 %v2618_v24, %v789_v40  ;;  %v820_v40 = vmul.f32 0.5, %v778_v21 }
 0x1ea   :  { %v794_v48 = vadd.f32 1.4214138, %v792_v60 }
 0x1eb   :  { %v793_v18 = vadd.f32 1.4214138, %v791_v27  ;;  %v818_v27 = vmul.f32 0.5, %v2587_v39 }
 0x1ec   :  { %v796_v41 = vmul.f32 %v2616_v63, %v794_v48 }
 0x1ed   :  { %v795_v30 = vmul.f32 %v2618_v24, %v793_v18 }
 0x1ee   :  { %v798_v35 = vadd.f32 -0.28449672, %v796_v41 }
 0x1ef   :  { %v797_v51 = vadd.f32 -0.28449672, %v795_v30 }
 0x1f0   :  { %v800_v57 = vmul.f32 %v2616_v63, %v798_v35 }
 0x1f1   :  { %v799_v59 = vmul.f32 %v2618_v24, %v797_v51 }
 0x1f2   :  { %v802_v46 = vadd.f32 0.2548296, %v800_v57 }
 0x1f3   :  { %v801_v38 = vadd.f32 0.2548296, %v799_v59 }
 0x1f4   :  { %v804_v2 = vmul.f32 %v2616_v63, %v802_v46 }
 0x1f5   :  { %v803_v25 = vmul.f32 %v2618_v24, %v801_v38 }
 0x1f6   :  { %v814_v52 = vmul.f32 %v2620_v37, %v804_v2 }
 0x1f7   :  { %v813_v61 = vmul.f32 %v2622_v26, %v803_v25 }
 0x1f8   :  { %v816_v1 = vsub.f32 1.0, %v814_v52 }
 0x1f9   :  { %v815_v60 = vsub.f32 1.0, %v813_v61 }
 0x1fa   :  { %v822_v48 = vmul.f32 %v820_v40, %v816_v1 }
 0x1fb   :  { %v821_v18 = vmul.f32 %v819_v17, %v815_v60 }
 0x1fc   :  { %v824_v41 = vadd.f32 %v822_v48, %v818_v27 }
 0x1fd   :  { %v823_v30 = vadd.f32 %v821_v18, %v817_v43 }
 0x1fe   :  { %v3247_v35 = vand.u32 4294901760, %v824_v41 }
 0x1ff   :  { %v3249_v51 = vand.u32 4294901760, %v823_v30 }
 0x200   :  { %v3252_v63 = vsub.f32 %v824_v41, %v3247_v35 }
 0x201   :  { %v925_v24 = vsub.f32 %v823_v30, %v3249_v51 }
 0x202   :  { %v936_v37 = vand.u32 4294901760, %v3252_v63 }
 0x203   :  { %v926_v38 = vand.u32 4294901760, %v925_v24 }
 0x204   :  { %v937_v46 = vsub.f32 %v3252_v63, %v936_v37 }
 0x205   :  { %v927_v39 = vsub.f32 %v925_v24, %v926_v38 }
 0x206   :  { %v938_v21 = vand.u32 4294901760, %v937_v46 }
 0x207   :  { %v928_v20 = vand.u32 4294901760, %v927_v39 }
 0x209   :  { %2025 = vmatprep.mubr.f32.mxu1 %v928_v20 }
 0x20a   :  { %2026 = vmatmul.mubr.f32.vlgmr.msra.gmra.mrb[0].mxu1 %v938_v21 }
 0x20b   :  { %2430 = vmatpush3.bf16.msra.mxu1 %v3101_v31  ;;  %2060 = vmatprep.mubr.f32.mxu1 %v3249_v51  ;;  %v3411_v31 = vand.u32 4294901760, %v3067_v12  ;;  %v3415_v12 = vand.u32 4294901760, %v3109_v0  ;;  %v3421_v0 = vand.u32 4294901760, %v3153_v7 }
 0x20c   :  { %2432 = vmatprep.subr.bf16.mxu1 %v3116_v36 }
 0x20f   :  { %2434 = vmatpush3.bf16.msra.mxu1 %v3116_v36  ;;  %v3412_v36 = vand.u32 4294901760, %v3069_v15  ;;  %v3416_v15 = vand.u32 4294901760, %v3111_v33  ;;  %v3422_v33 = vand.u32 4294901760, %v3156_v8 }
 0x210   :  { %2436 = vmatprep.subr.bf16.mxu1 %v3130_v42 }
 0x213   :  { %2438 = vmatpush3.bf16.msra.mxu1 %v3130_v42  ;;  %v2523_v42 = vpack.c.bf16 %v3412_v36, %v3411_v31 }
 0x214   :  { %2440 = vmatprep.subr.bf16.mxu1 %v3158_v9 }
 0x217   :  { %2442 = vmatpush3.bf16.msra.mxu1 %v3158_v9  ;;  %v3413_v9 = vand.u32 4294901760, %v3093_v28  ;;  %v3418_v28 = vand.u32 4294901760, %v3126_v13  ;;  %v3425_v13 = vld [vmem:[#allocation14_spill] sm:$0xff] }
 0x218   :  { %2444 = vmatprep.subr.bf16.mxu1 %v3162_v62 }
 0x21b   :  { %2446 = vmatpush3.bf16.msra.mxu1 %v3162_v62  ;;  %v3414_v62 = vand.u32 4294901760, %v3095_v29 }
 0x21c   :  { %2448 = vmatprep.subr.bf16.mxu1 %v3182_v50 }
 0x21f   :  { %2450 = vmatpush3.bf16.msra.mxu1 %v3182_v50  ;;  %v2527_v50 = vpack.c.bf16 %v3414_v62, %v3413_v9 }
 0x220   :  { %2452 = vmatprep.subr.bf16.mxu1 %v3208_v19 }
 0x223   :  { %2454 = vmatpush3.bf16.msra.mxu1 %v3208_v19  ;;  %v2531_v19 = vpack.c.bf16 %v3416_v15, %v3415_v12 }
 0x224   :  { %2456 = vmatprep.subr.bf16.mxu1 %v3210_v3 }
 0x227   :  { %2458 = vmatpush3.bf16.msra.mxu1 %v3210_v3  ;;  %v3417_v3 = vand.u32 4294901760, %v3124_v10  ;;  %v3423_v10 = vld [vmem:[#allocation13_spill] sm:$0xff] }
 0x228   :  { %2460 = vmatprep.subr.bf16.mxu1 %v3214_v4 }
 0x229   :  { %v2535_v29 = vpack.c.bf16 %v3418_v28, %v3417_v3 }
 0x22a   :  { %2061 = vmatmul.mubr.f32.vlgmr.msra.gmra.mrb[0].mxu1 %v3247_v35 }
 0x22b   :  { %2462 = vmatpush3.bf16.msra.mxu1 %v3214_v4  ;;  %2095 = vmatprep.mubr.f32.mxu1 %v925_v24  ;;  %v3419_v4 = vand.u32 4294901760, %v3136_v55  ;;  %v3427_v55 = vld [vmem:[#allocation15_spill] sm:$0xff] }
 0x22c   :  { %2464 = vmatprep.subr.bf16.mxu1 %v3218_v6 }
 0x22f   :  { %2466 = vmatpush3.bf16.msra.mxu1 %v3218_v6  ;;  %v3420_v6 = vand.u32 4294901760, %v3139_v56  ;;  %v3429_v56 = vld [vmem:[#allocation16_spill] sm:$0xff] }
 0x230   :  { %2468 = vmatprep.subr.bf16.mxu1 %v3222_v49  ;;  %v3430_v22 = vand.u32 4294901760, %v3429_v56 }
 0x233   :  { %2470 = vmatpush3.bf16.msra.mxu1 %v3222_v49  ;;  %v2539_v49 = vpack.c.bf16 %v3420_v6, %v3419_v4 }
 0x234   :  { %2472 = vmatprep.subr.bf16.mxu1 %v3226_v54 }
 0x237   :  { %2474 = vmatpush3.bf16.msra.mxu1 %v3226_v54  ;;  %v2543_v54 = vpack.c.bf16 %v3422_v33, %v3421_v0 }
 0x238   :  { %2476 = vmatprep.subr.bf16.mxu1 %v3230_v32 }
 0x23b   :  { %2478 = vmatpush3.bf16.msra.mxu1 %v3230_v32  ;;  %v3424_v32 = vand.u32 4294901760, %v3423_v10 }
 0x23c   :  { %2480 = vmatprep.subr.bf16.mxu1 %v3234_v16 }
 0x23f   :  { %2482 = vmatpush3.bf16.msra.mxu1 %v3234_v16  ;;  %v3426_v16 = vand.u32 4294901760, %v3425_v13 }
 0x240   :  { %2484 = vmatprep.subr.bf16.mxu1 %v3238_v44 }
 0x243   :  { %2486 = vmatpush3.bf16.msra.mxu1 %v3238_v44  ;;  %v2547_v44 = vpack.c.bf16 %v3426_v16, %v3424_v32 }
 0x244   :  { %2488 = vmatprep.subr.bf16.mxu1 %v3242_v34 }
 0x247   :  { %2490 = vmatpush3.bf16.msra.mxu1 %v3242_v34  ;;  %v3428_v34 = vand.u32 4294901760, %v3427_v55 }
 0x248   :  { %2492 = vmatprep.subr.bf16.mxu1 %v3019_v23 }
 0x249   :  { %v2551_v57 = vpack.c.bf16 %v3430_v22, %v3428_v34 }
 0x24a   :  { %2096 = vmatmul.mubr.f32.vlgmr.msra.gmra.mrb[0].mxu1 %v3252_v63 }
 0x24b   :  { %2494 = vmatpush3.bf16.msra.mxu1 %v3019_v23  ;;  %2130 = vmatprep.mubr.f32.mxu1 %v926_v38 }
 0x24c   :  { %2496 = vmatprep.subr.bf16.mxu1 %v3023_v53 }
 0x24f   :  { %2498 = vmatpush3.bf16.msra.mxu1 %v3023_v53 }
 0x250   :  { %2500 = vmatprep.subr.bf16.mxu1 %v3027_v58 }
 0x253   :  { %2502 = vmatpush3.bf16.msra.mxu1 %v3027_v58 }
 0x254   :  { %2504 = vmatprep.subr.bf16.mxu1 %v3031_v5 }
 0x257   :  { %2506 = vmatpush3.bf16.msra.mxu1 %v3031_v5 }
 0x258   :  { %2508 = vmatprep.subr.bf16.mxu1 %v3041_v14 }
 0x25b   :  { %2510 = vmatpush3.bf16.msra.mxu1 %v3041_v14 }
 0x25c   :  { %2512 = vmatprep.subr.bf16.mxu1 %v3051_v45 }
 0x25f   :  { %2514 = vmatpush3.bf16.msra.mxu1 %v3051_v45 }
 0x260   :  { %2516 = vmatprep.subr.bf16.mxu1 %v3065_v11 }
 0x263   :  { %2518 = vmatpush3.bf16.msra.mxu1 %v3065_v11 }
 0x264   :  { %2520 = vmatprep.subr.bf16.mxu1 %v3085_v47 }
 0x267   :  { %2522 = vmatpush3.bf16.msra.mxu1 %v3085_v47 }
 0x268   :  { %2524 = vmatprep.subr.bf16.mxu1 %v2523_v42 }
 0x26a   :  { %2131 = vmatmul.mubr.f32.vlgmr.msra.gmra.mrb[0].mxu1 %v936_v37 }
 0x26b   :  { %2526 = vmatpush3.bf16.msra.mxu1 %v2523_v42  ;;  %2165 = vmatprep.mubr.f32.mxu1 %v3249_v51 }
 0x26c   :  { %2528 = vmatprep.subr.bf16.mxu1 %v2527_v50 }
 0x26f   :  { %2530 = vmatpush3.bf16.msra.mxu1 %v2527_v50 }
 0x270   :  { %2532 = vmatprep.subr.bf16.mxu1 %v2531_v19 }
 0x273   :  { %2534 = vmatpush3.bf16.msra.mxu1 %v2531_v19 }
 0x274   :  { %2536 = vmatprep.subr.bf16.mxu1 %v2535_v29 }
 0x277   :  { %2538 = vmatpush3.bf16.msra.mxu1 %v2535_v29 }
 0x278   :  { %2540 = vmatprep.subr.bf16.mxu1 %v2539_v49 }
 0x27b   :  { %2542 = vmatpush3.bf16.msra.mxu1 %v2539_v49 }
 0x27c   :  { %2544 = vmatprep.subr.bf16.mxu1 %v2543_v54 }
 0x27f   :  { %2546 = vmatpush3.bf16.msra.mxu1 %v2543_v54 }
 0x280   :  { %2548 = vmatprep.subr.bf16.mxu1 %v2547_v44 }
 0x283   :  { %2550 = vmatpush3.bf16.msra.mxu1 %v2547_v44 }
 0x284   :  { %2552 = vmatprep.subr.bf16.mxu1 %v2551_v57 }
 0x287   :  { %2554 = vmatpush3.bf16.msra.mxu1 %v2551_v57 }
 0x288   :  { %2556 = vmatprep.subr.bf16.mxu1 %v3019_v23 }
 0x28a   :  { %2166 = vmatmul.mubr.f32.vlgmr.msra.gmra.mrb[0].mxu1 %v3247_v35 }
 0x28b   :  { %2558 = vmatpush3.bf16.msra.mxu1 %v3019_v23  ;;  %2200 = vmatprep.mubr.f32.mxu1 %v3249_v51  ;;  %v1566_v23 = vld [vmem:[%s3385_s4] ss:$0 sm:$0xff] }
 0x28c   :  { %2560 = vmatprep.subr.bf16.mxu1 %v3023_v53 }
 0x28f   :  { %2562 = vmatpush3.bf16.msra.mxu1 %v3023_v53 }
 0x290   :  { %2564 = vmatprep.subr.bf16.mxu1 %v3027_v58 }
 0x293   :  { %2566 = vmatpush3.bf16.msra.mxu1 %v3027_v58 }
 0x294   :  { %2568 = vmatprep.subr.bf16.mxu1 %v3031_v5 }
 0x297   :  { %2570 = vmatpush3.bf16.msra.mxu1 %v3031_v5 }
 0x298   :  { %2572 = vmatprep.subr.bf16.mxu1 %v3041_v14 }
 0x29b   :  { %2574 = vmatpush3.bf16.msra.mxu1 %v3041_v14 }
 0x29c   :  { %2576 = vmatprep.subr.bf16.mxu1 %v3051_v45 }
 0x29f   :  { %2578 = vmatpush3.bf16.msra.mxu1 %v3051_v45 }
 0x2a0   :  { %2580 = vmatprep.subr.bf16.mxu1 %v3065_v11 }
 0x2a3   :  { %2582 = vmatpush3.bf16.msra.mxu1 %v3065_v11 }
 0x2a4   :  { %2584 = vmatprep.subr.bf16.mxu1 %v3085_v47 }
 0x2a7   :  { %2586 = vmatpush3.bf16.msra.mxu1 %v3085_v47 }
 0x2aa   :  { %2201 = vmatmul.mubr.f32.vlgmr.msra.gmra.mrb[0].mxu1 %v3247_v35 }
 0x37d   :  { %v2202_v53 = vpop.f32.mrb[0].mxu1 }
 0x37e   :  { %v1544_v58 = vadd.f32 %v2202_v53, %v1566_v23  ;;  %v1517_v5 = vpop.f32.mrb[1].mxu1 }
 0x37f   :  { %v1543_v14 = vadd.f32 %v1566_v23, %v1517_v5 }
 0x380   :  { %1546 = vst [vmem:[#allocation9 + $0x8] sm:$0xff] %v1544_v58 }
 0x381   :  { %1545 = vst [vmem:[#allocation9] sm:$0xff] %v1543_v14 }
 0x382   :  { %2700 = shalt.err (!%p2697_p0)
}
 0x383   :  { %s2701_s4 = scalar_lea.hbm %s3386_s5, 256 }
 0x384   :  { %p2702_p1 = scmp.ne.s32.totalorder %s3386_s5, %s2701_s4  ;;  %p2705_p2 = scmp.lt.u32.totalorder %s2701_s4, %s3386_s5 }
 0x386   :  { %p2707_p3 = pnand %p2705_p2, %p2702_p1 }
 0x388   :  { %2710 = shalt.err (!%p2707_p3)
}
 0x389   :  { %1558 = dma.vmem_to_hbm [thread:$0]  %s1553_s9, 256, %s3386_s5, [#allocation5], %s2719_s30, %s2719_s30, %s2720_s6  }
 0x38a   :  { %2715 = dma.done.wait [#allocation5], 256  }
 0x38b   :  { %2716 = vsyncadd [#allocation5], 4294967040 }
 0x38c   :  { %1562 = vsyncpa [#allocation4], 1 }
 0x38d   :  { %1563 = vsyncpa [#allocation7], 1 }
 0x38e   :  { %1564 = vsyncpa [#allocation5], 1 }

</bundles_post_ra>
